<compile_context>
chip_gen: v6e
topology: v6e:2x2x1
jax: 0.10.0
libtpu: 0.0.40
codegen_flags: <defaults>
</compile_context>

<pallas_src>
import functools

import jax
import jax.numpy as jnp
from jax import lax
from jax.experimental import pallas as pl
from jax.experimental.pallas import tpu as pltpu

KERNEL_SIZES = (5, 9, 13)
POOL_K = 5                          # SPPF cascade kernel: 5/9/13 == 5 applied 1x/2x/3x
N_STAGES = len(KERNEL_SIZES)
PAD = POOL_K // 2


def _silu(t):
    # exact SiLU = t * sigmoid(t); exp runs on the EUP, the divide is exact.
    return t * (1.0 / (1.0 + jnp.exp(-t)))


# --------------------- fused conv1 + SPPF pools + conv2 kernel --------------------
def _spp_fused_kernel(x_ref, w1_ref, s1_ref, b1_ref, w2_ref, s2_ref, b2_ref,
                      o_ref, ybuf, hbuf, acc, *, h, w, hid):
    hp, wp = h + 2 * PAD, w + 2 * PAD

    # conv1: 1x1 conv + folded BN + SiLU as a channels-major matmul
    #   (hid, cin) @ (cin, h*w): lanes carry h*w -> lane-dense MXU/VPU work.
    y = jnp.dot(w1_ref[...], x_ref[...], preferred_element_type=jnp.float32)
    y = _silu(y * s1_ref[...] + b1_ref[...])

    # conv2 partial sum for the un-pooled branch (row block 0 of w2).
    acc[...] = jnp.dot(w2_ref[0], y, preferred_element_type=jnp.float32)

    # -inf border strips of the padded pooling buffer. Only the strips are
    # written (the interior is fully rewritten below) instead of the whole
    # (hid, H+4, W+4) splat; done per image so a megacore split of the batch
    # axis (per-core scratch) stays correct.
    ninf = -jnp.inf
    ybuf[:, pl.ds(0, PAD), :] = jnp.full((hid, PAD, wp), ninf, jnp.float32)
    ybuf[:, pl.ds(PAD + h, PAD), :] = jnp.full((hid, PAD, wp), ninf, jnp.float32)
    ybuf[:, :, pl.ds(0, PAD)] = jnp.full((hid, hp, PAD), ninf, jnp.float32)
    ybuf[:, :, pl.ds(PAD + w, PAD)] = jnp.full((hid, hp, PAD), ninf, jnp.float32)

    # Stage y in the padded VMEM buffer (interior only).
    # TODO(synk): the (hid, h*w) -> (hid, h, w) reshape is a small VMEM relayout;
    #             revisit for production spatial sizes (tile-aligned views).
    ybuf[:, pl.ds(PAD, h), pl.ds(PAD, w)] = y.reshape(hid, h, w)

    # SPPF cascade: maxpool5 applied 1x/2x/3x == maxpool 5/9/13 with -inf padding.
    for s in range(N_STAGES):
        # separable max, horizontal pass (lane-dim shifts), staged through VMEM.
        # TODO(synk): for production widths generate the shifted operands with
        #             pltpu.roll (XLU is idle here) instead of shifted lane loads.
        hmax = ybuf[:, :, pl.ds(0, w)]
        for d in range(1, POOL_K):
            hmax = jnp.maximum(hmax, ybuf[:, :, pl.ds(d, w)])
        hbuf[...] = hmax
        # vertical pass (sublane-dim shifts) over row slices of the scratch.
        pooled = hbuf[:, pl.ds(0, h), :]
        for d in range(1, POOL_K):
            pooled = jnp.maximum(pooled, hbuf[:, pl.ds(d, h), :])
        # conv2 partial sum for this pooled branch (row block s+1 of w2).
        acc[...] += jnp.dot(w2_ref[s + 1], pooled.reshape(hid, h * w),
                            preferred_element_type=jnp.float32)
        # feed the next cascade stage (the -inf border strips are never touched).
        if s + 1 < N_STAGES:
            ybuf[:, pl.ds(PAD, h), pl.ds(PAD, w)] = pooled

    # conv2 epilogue: folded BN + SiLU; single lane-dense HBM store
    # (last dim h*w is a multiple of 128 -> unmasked vst, no masked tail).
    o_ref[...] = _silu(acc[...] * s2_ref[...] + b2_ref[...]).astype(o_ref.dtype)


# ---------------------------------- full forward ----------------------------------
def spp_bottleneck_forward(x_nchw, params):
    n, cin, h, w = x_nchw.shape
    hid = params["w1"].shape[0]
    cout = params["w2"].shape[0]
    hw = h * w

    # Channels-major kernel: only free contiguous reshapes here, no transposes.
    x2d = x_nchw.reshape(n, cin, hw)
    # Split w2 (cout, 4*hid) into the 4 blocks matching the [y, p5, p9, p13] concat.
    w2_blocks = jnp.transpose(params["w2"].reshape(cout, N_STAGES + 1, hid), (1, 0, 2))

    # TODO(synk): for large images on v7x (64 MiB VMEM) row-tile the per-image block
    #             with a 6-row halo (3 stages x pad=2); the test shapes easily fit.
    # TODO(synk): for production channel widths (>=128) cast the matmul operands to
    #             bf16 (keep the f32 accumulator) to use the v6e/v7x 256-wide MXU.
    kernel = functools.partial(_spp_fused_kernel, h=h, w=w, hid=hid)
    out = pl.pallas_call(
        kernel,
        out_shape=jax.ShapeDtypeStruct((n, cout, hw), x_nchw.dtype),
        grid_spec=pltpu.PrefetchScalarGridSpec(
            num_scalar_prefetch=0,
            grid=(n,),
            in_specs=[
                pl.BlockSpec((None, cin, hw), lambda b: (b, 0, 0)),      # x (squeezed batch)
                pl.BlockSpec((hid, cin), lambda b: (0, 0)),              # w1
                pl.BlockSpec((hid, 1), lambda b: (0, 0)),                # scale1
                pl.BlockSpec((hid, 1), lambda b: (0, 0)),                # bias1
                pl.BlockSpec((N_STAGES + 1, cout, hid), lambda b: (0, 0, 0)),  # w2 blocks
                pl.BlockSpec((cout, 1), lambda b: (0, 0)),               # scale2
                pl.BlockSpec((cout, 1), lambda b: (0, 0)),               # bias2
            ],
            out_specs=pl.BlockSpec((None, cout, hw), lambda b: (b, 0, 0)),
            scratch_shapes=[
                pltpu.VMEM((hid, h + 2 * PAD, w + 2 * PAD), jnp.float32),  # ybuf (padded)
                pltpu.VMEM((hid, h + 2 * PAD, w), jnp.float32),            # hbuf (h-pass)
                pltpu.VMEM((cout, hw), jnp.float32),                       # conv2 accumulator
            ],
        ),
        compiler_params=pltpu.CompilerParams(
            dimension_semantics=("parallel",),
            vmem_limit_bytes=32 * 1024 * 1024,
        ),
    )(x2d, params["w1"], params["scale1"], params["bias1"],
      w2_blocks, params["scale2"], params["bias2"])
    return out.reshape(n, cout, h, w)


# ------------------------------ deterministic params -------------------------------
def make_params(key, in_channels, out_channels, eps=1e-3):
    hidden = in_channels // 2
    cat_ch = hidden * (len(KERNEL_SIZES) + 1)
    ks = jax.random.split(key, 10)

    def bn_fold(kg, kb, km, kv, c):
        gamma = 1.0 + 0.1 * jax.random.normal(kg, (c,), jnp.float32)
        beta = 0.1 * jax.random.normal(kb, (c,), jnp.float32)
        mean = 0.1 * jax.random.normal(km, (c,), jnp.float32)
        var = jnp.abs(1.0 + 0.1 * jax.random.normal(kv, (c,), jnp.float32))
        scale = gamma / jnp.sqrt(var + eps)
        bias = beta - mean * scale
        return scale.reshape(c, 1), bias.reshape(c, 1)      # (C, 1): broadcast over lanes

    # torch conv weight (Cout, Cin, 1, 1) squeezed to (Cout, Cin): channels-major matmul
    w1 = 0.1 * jax.random.normal(ks[0], (hidden, in_channels), jnp.float32)
    scale1, bias1 = bn_fold(ks[1], ks[2], ks[3], ks[4], hidden)
    w2 = 0.1 * jax.random.normal(ks[5], (out_channels, cat_ch), jnp.float32)
    scale2, bias2 = bn_fold(ks[6], ks[7], ks[8], ks[9], out_channels)
    return dict(w1=w1, scale1=scale1, bias1=bias1,
                w2=w2, scale2=scale2, bias2=bias2)


# ----------------------------------- reference -------------------------------------
def _reference(x_nchw, params):
    def cbs(z, wt, s, b):
        y = jnp.einsum("oc,nchw->nohw", wt, z, precision=lax.Precision.HIGHEST)
        y = y * s.reshape(1, -1, 1, 1) + b.reshape(1, -1, 1, 1)
        return y * jax.nn.sigmoid(y)

    y = cbs(x_nchw, params["w1"], params["scale1"], params["bias1"])
    pools = []
    for ksz in KERNEL_SIZES:                      # direct (non-cascaded) pools
        r = ksz // 2
        p = lax.reduce_window(y, -jnp.inf, lax.max,
                              (1, 1, ksz, ksz), (1, 1, 1, 1),
                              ((0, 0), (0, 0), (r, r), (r, r)))
        pools.append(p)
    cat = jnp.concatenate([y] + pools, axis=1)
    return cbs(cat, params["w2"], params["scale2"], params["bias2"])


if __name__ == "__main__":
    key = jax.random.PRNGKey(0)
    kx, kp = jax.random.split(key)
    N, C, H, W = 2, 4, 16, 16                     # in_channels = out_channels = 4
    x = jax.random.normal(kx, (N, C, H, W), jnp.float32)
    params = make_params(kp, in_channels=C, out_channels=C)

    out = jax.block_until_ready(spp_bottleneck_forward(x, params))

    ref = _reference(x, params)
    assert out.shape == (N, C, H, W)
    max_err = float(jnp.max(jnp.abs(out - ref)))
    # tolerance covers MXU vs XLA matmul accumulation differences (SiLU is now exact)
    assert jnp.allclose(out, ref, atol=2e-3, rtol=2e-3), max_err
    print("KERNEL_OK")
</pallas_src>

<mosaic_0001>
module attributes {stable_mosaic.version = 11 : i64} {
  func.func @_spp_fused_kernel(%arg0: i32, %arg1: memref<1x4x256xf32, #tpu.memory_space<vmem>>, %arg2: memref<2x4xf32, #tpu.memory_space<vmem>>, %arg3: memref<2x1xf32, #tpu.memory_space<vmem>>, %arg4: memref<2x1xf32, #tpu.memory_space<vmem>>, %arg5: memref<4x4x2xf32, #tpu.memory_space<vmem>>, %arg6: memref<4x1xf32, #tpu.memory_space<vmem>>, %arg7: memref<4x1xf32, #tpu.memory_space<vmem>>, %arg8: memref<1x4x256xf32, #tpu.memory_space<vmem>>, %arg9: memref<2x20x20xf32, #tpu.memory_space<vmem>>, %arg10: memref<2x20x16xf32, #tpu.memory_space<vmem>>, %arg11: memref<4x256xf32, #tpu.memory_space<vmem>>) attributes {dimension_semantics = [#tpu.dimension_semantics<parallel>], iteration_bounds = array<i64: 2>, scalar_prefetch = 0 : i64, scratch_operands = 3 : i64, tpu.core_type = #tpu.core_type<tc>, window_params = [{transform_indices = @transform_0, window_bounds = array<i64: 1, 4, 256>}, {pipeline_mode = #tpu.pipeline_mode<synchronous>, transform_indices = @transform_1, window_bounds = array<i64: 2, 4>}, {pipeline_mode = #tpu.pipeline_mode<synchronous>, transform_indices = @transform_2, window_bounds = array<i64: 2, 1>}, {pipeline_mode = #tpu.pipeline_mode<synchronous>, transform_indices = @transform_3, window_bounds = array<i64: 2, 1>}, {pipeline_mode = #tpu.pipeline_mode<synchronous>, transform_indices = @transform_4, window_bounds = array<i64: 4, 4, 2>}, {pipeline_mode = #tpu.pipeline_mode<synchronous>, transform_indices = @transform_5, window_bounds = array<i64: 4, 1>}, {pipeline_mode = #tpu.pipeline_mode<synchronous>, transform_indices = @transform_6, window_bounds = array<i64: 4, 1>}, {transform_indices = @transform_7, window_bounds = array<i64: 1, 4, 256>}]} {
    %c0 = arith.constant 0 : index
    %c0_0 = arith.constant 0 : index
    %0 = vector.load %arg2[%c0, %c0_0] : memref<2x4xf32, #tpu.memory_space<vmem>>, vector<2x4xf32>
    %c0_1 = arith.constant 0 : index
    %c0_2 = arith.constant 0 : index
    %c0_3 = arith.constant 0 : index
    %1 = vector.load %arg1[%c0_1, %c0_2, %c0_3] : memref<1x4x256xf32, #tpu.memory_space<vmem>>, vector<1x4x256xf32>
    %2 = vector.shape_cast %1 : vector<1x4x256xf32> to vector<4x256xf32>
    %cst = arith.constant dense<0.000000e+00> : vector<2x256xf32>
    %3 = tpu.matmul %0, %2, %cst {dimension_numbers = #tpu.dot_dimension_numbers<[1], [0], [0], [1], [0, 0, 1, 1], [], []>} : vector<2x4xf32>, vector<4x256xf32>, vector<2x256xf32> -> vector<2x256xf32>
    %c0_4 = arith.constant 0 : index
    %c0_5 = arith.constant 0 : index
    %4 = vector.load %arg3[%c0_4, %c0_5] : memref<2x1xf32, #tpu.memory_space<vmem>>, vector<2x1xf32>
    %5 = vector.broadcast %4 : vector<2x1xf32> to vector<2x256xf32>
    %6 = arith.mulf %3, %5 : vector<2x256xf32>
    %c0_6 = arith.constant 0 : index
    %c0_7 = arith.constant 0 : index
    %7 = vector.load %arg4[%c0_6, %c0_7] : memref<2x1xf32, #tpu.memory_space<vmem>>, vector<2x1xf32>
    %8 = vector.broadcast %7 : vector<2x1xf32> to vector<2x256xf32>
    %9 = arith.addf %6, %8 : vector<2x256xf32>
    %cst_8 = arith.constant 0.000000e+00 : f32
    %10 = vector.broadcast %cst_8 : f32 to vector<2x256xf32>
    %11 = arith.subf %10, %9 : vector<2x256xf32>
    %12 = math.exp %11 : vector<2x256xf32>
    %cst_9 = arith.constant 1.000000e+00 : f32
    %13 = vector.broadcast %cst_9 : f32 to vector<2x256xf32>
    %14 = arith.addf %13, %12 : vector<2x256xf32>
    %cst_10 = arith.constant 1.000000e+00 : f32
    %15 = vector.broadcast %cst_10 : f32 to vector<2x256xf32>
    %16 = arith.divf %15, %14 : vector<2x256xf32>
    %17 = arith.mulf %9, %16 : vector<2x256xf32>
    %c0_11 = arith.constant 0 : index
    %c0_12 = arith.constant 0 : index
    %c0_13 = arith.constant 0 : index
    %18 = vector.load %arg5[%c0_11, %c0_12, %c0_13] : memref<4x4x2xf32, #tpu.memory_space<vmem>>, vector<1x4x2xf32>
    %19 = vector.shape_cast %18 : vector<1x4x2xf32> to vector<4x2xf32>
    %cst_14 = arith.constant dense<0.000000e+00> : vector<4x256xf32>
    %20 = tpu.matmul %19, %17, %cst_14 {dimension_numbers = #tpu.dot_dimension_numbers<[1], [0], [0], [1], [0, 0, 1, 1], [], []>} : vector<4x2xf32>, vector<2x256xf32>, vector<4x256xf32> -> vector<4x256xf32>
    %c0_15 = arith.constant 0 : index
    %c0_16 = arith.constant 0 : index
    %21 = vector.load %arg11[%c0_15, %c0_16] : memref<4x256xf32, #tpu.memory_space<vmem>>, vector<4x256xf32>
    tpu.vector_store %arg11[%c0_15, %c0_16], %20 {strides = array<i32>} : memref<4x256xf32, #tpu.memory_space<vmem>>, vector<4x256xf32>,
    %cst_17 = arith.constant 0xFF800000 : f32
    %22 = vector.broadcast %cst_17 : f32 to vector<2x2x20xf32>
    %c0_18 = arith.constant 0 : index
    %c0_19 = arith.constant 0 : index
    %c0_20 = arith.constant 0 : index
    %23 = vector.load %arg9[%c0_18, %c0_19, %c0_20] : memref<2x20x20xf32, #tpu.memory_space<vmem>>, vector<2x2x20xf32>
    tpu.vector_store %arg9[%c0_18, %c0_19, %c0_20], %22 {strides = array<i32>} : memref<2x20x20xf32, #tpu.memory_space<vmem>>, vector<2x2x20xf32>,
    %cst_21 = arith.constant 0xFF800000 : f32
    %24 = vector.broadcast %cst_21 : f32 to vector<2x2x20xf32>
    %c0_22 = arith.constant 0 : index
    %c18 = arith.constant 18 : index
    %c0_23 = arith.constant 0 : index
    %25 = vector.load %arg9[%c0_22, %c18, %c0_23] : memref<2x20x20xf32, #tpu.memory_space<vmem>>, vector<2x2x20xf32>
    tpu.vector_store %arg9[%c0_22, %c18, %c0_23], %24 {strides = array<i32>} : memref<2x20x20xf32, #tpu.memory_space<vmem>>, vector<2x2x20xf32>,
    %cst_24 = arith.constant 0xFF800000 : f32
    %26 = vector.broadcast %cst_24 : f32 to vector<2x20x2xf32>
    %c0_25 = arith.constant 0 : index
    %c0_26 = arith.constant 0 : index
    %c0_27 = arith.constant 0 : index
    %27 = vector.load %arg9[%c0_25, %c0_26, %c0_27] : memref<2x20x20xf32, #tpu.memory_space<vmem>>, vector<2x20x2xf32>
    tpu.vector_store %arg9[%c0_25, %c0_26, %c0_27], %26 {strides = array<i32>} : memref<2x20x20xf32, #tpu.memory_space<vmem>>, vector<2x20x2xf32>,
    %cst_28 = arith.constant 0xFF800000 : f32
    %28 = vector.broadcast %cst_28 : f32 to vector<2x20x2xf32>
    %c0_29 = arith.constant 0 : index
    %c0_30 = arith.constant 0 : index
    %c18_31 = arith.constant 18 : index
    %29 = vector.load %arg9[%c0_29, %c0_30, %c18_31] : memref<2x20x20xf32, #tpu.memory_space<vmem>>, vector<2x20x2xf32>
    tpu.vector_store %arg9[%c0_29, %c0_30, %c18_31], %28 {strides = array<i32>} : memref<2x20x20xf32, #tpu.memory_space<vmem>>, vector<2x20x2xf32>,
    %30 = vector.shape_cast %17 : vector<2x256xf32> to vector<2x16x16xf32>
    %c0_32 = arith.constant 0 : index
    %c2 = arith.constant 2 : index
    %c2_33 = arith.constant 2 : index
    %31 = vector.load %arg9[%c0_32, %c2, %c2_33] : memref<2x20x20xf32, #tpu.memory_space<vmem>>, vector<2x16x16xf32>
    tpu.vector_store %arg9[%c0_32, %c2, %c2_33], %30 {strides = array<i32>} : memref<2x20x20xf32, #tpu.memory_space<vmem>>, vector<2x16x16xf32>,
    %c0_34 = arith.constant 0 : index
    %c0_35 = arith.constant 0 : index
    %c0_36 = arith.constant 0 : index
    %32 = vector.load %arg9[%c0_34, %c0_35, %c0_36] : memref<2x20x20xf32, #tpu.memory_space<vmem>>, vector<2x20x16xf32>
    %c0_37 = arith.constant 0 : index
    %c0_38 = arith.constant 0 : index
    %c1 = arith.constant 1 : index
    %33 = vector.load %arg9[%c0_37, %c0_38, %c1] : memref<2x20x20xf32, #tpu.memory_space<vmem>>, vector<2x20x16xf32>
    %34 = arith.maximumf %32, %33 : vector<2x20x16xf32>
    %c0_39 = arith.constant 0 : index
    %c0_40 = arith.constant 0 : index
    %c2_41 = arith.constant 2 : index
    %35 = vector.load %arg9[%c0_39, %c0_40, %c2_41] : memref<2x20x20xf32, #tpu.memory_space<vmem>>, vector<2x20x16xf32>
    %36 = arith.maximumf %34, %35 : vector<2x20x16xf32>
    %c0_42 = arith.constant 0 : index
    %c0_43 = arith.constant 0 : index
    %c3 = arith.constant 3 : index
    %37 = vector.load %arg9[%c0_42, %c0_43, %c3] : memref<2x20x20xf32, #tpu.memory_space<vmem>>, vector<2x20x16xf32>
    %38 = arith.maximumf %36, %37 : vector<2x20x16xf32>
    %c0_44 = arith.constant 0 : index
    %c0_45 = arith.constant 0 : index
    %c4 = arith.constant 4 : index
    %39 = vector.load %arg9[%c0_44, %c0_45, %c4] : memref<2x20x20xf32, #tpu.memory_space<vmem>>, vector<2x20x16xf32>
    %40 = arith.maximumf %38, %39 : vector<2x20x16xf32>
    %c0_46 = arith.constant 0 : index
    %c0_47 = arith.constant 0 : index
    %c0_48 = arith.constant 0 : index
    %41 = vector.load %arg10[%c0_46, %c0_47, %c0_48] : memref<2x20x16xf32, #tpu.memory_space<vmem>>, vector<2x20x16xf32>
    tpu.vector_store %arg10[%c0_46, %c0_47, %c0_48], %40 {strides = array<i32>} : memref<2x20x16xf32, #tpu.memory_space<vmem>>, vector<2x20x16xf32>,
    %c0_49 = arith.constant 0 : index
    %c0_50 = arith.constant 0 : index
    %c0_51 = arith.constant 0 : index
    %42 = vector.load %arg10[%c0_49, %c0_50, %c0_51] : memref<2x20x16xf32, #tpu.memory_space<vmem>>, vector<2x16x16xf32>
    %c0_52 = arith.constant 0 : index
    %c1_53 = arith.constant 1 : index
    %c0_54 = arith.constant 0 : index
    %43 = vector.load %arg10[%c0_52, %c1_53, %c0_54] : memref<2x20x16xf32, #tpu.memory_space<vmem>>, vector<2x16x16xf32>
    %44 = arith.maximumf %42, %43 : vector<2x16x16xf32>
    %c0_55 = arith.constant 0 : index
    %c2_56 = arith.constant 2 : index
    %c0_57 = arith.constant 0 : index
    %45 = vector.load %arg10[%c0_55, %c2_56, %c0_57] : memref<2x20x16xf32, #tpu.memory_space<vmem>>, vector<2x16x16xf32>
    %46 = arith.maximumf %44, %45 : vector<2x16x16xf32>
    %c0_58 = arith.constant 0 : index
    %c3_59 = arith.constant 3 : index
    %c0_60 = arith.constant 0 : index
    %47 = vector.load %arg10[%c0_58, %c3_59, %c0_60] : memref<2x20x16xf32, #tpu.memory_space<vmem>>, vector<2x16x16xf32>
    %48 = arith.maximumf %46, %47 : vector<2x16x16xf32>
    %c0_61 = arith.constant 0 : index
    %c4_62 = arith.constant 4 : index
    %c0_63 = arith.constant 0 : index
    %49 = vector.load %arg10[%c0_61, %c4_62, %c0_63] : memref<2x20x16xf32, #tpu.memory_space<vmem>>, vector<2x16x16xf32>
    %50 = arith.maximumf %48, %49 : vector<2x16x16xf32>
    %c0_64 = arith.constant 0 : index
    %c0_65 = arith.constant 0 : index
    %51 = vector.load %arg11[%c0_64, %c0_65] : memref<4x256xf32, #tpu.memory_space<vmem>>, vector<4x256xf32>
    %c1_66 = arith.constant 1 : index
    %c0_67 = arith.constant 0 : index
    %c0_68 = arith.constant 0 : index
    %52 = vector.load %arg5[%c1_66, %c0_67, %c0_68] : memref<4x4x2xf32, #tpu.memory_space<vmem>>, vector<1x4x2xf32>
    %53 = vector.shape_cast %52 : vector<1x4x2xf32> to vector<4x2xf32>
    %54 = vector.shape_cast %50 : vector<2x16x16xf32> to vector<2x256xf32>
    %cst_69 = arith.constant dense<0.000000e+00> : vector<4x256xf32>
    %55 = tpu.matmul %53, %54, %cst_69 {dimension_numbers = #tpu.dot_dimension_numbers<[1], [0], [0], [1], [0, 0, 1, 1], [], []>} : vector<4x2xf32>, vector<2x256xf32>, vector<4x256xf32> -> vector<4x256xf32>
    %56 = arith.addf %51, %55 : vector<4x256xf32>
    %c0_70 = arith.constant 0 : index
    %c0_71 = arith.constant 0 : index
    %57 = vector.load %arg11[%c0_70, %c0_71] : memref<4x256xf32, #tpu.memory_space<vmem>>, vector<4x256xf32>
    tpu.vector_store %arg11[%c0_70, %c0_71], %56 {strides = array<i32>} : memref<4x256xf32, #tpu.memory_space<vmem>>, vector<4x256xf32>,
    %c0_72 = arith.constant 0 : index
    %c2_73 = arith.constant 2 : index
    %c2_74 = arith.constant 2 : index
    %58 = vector.load %arg9[%c0_72, %c2_73, %c2_74] : memref<2x20x20xf32, #tpu.memory_space<vmem>>, vector<2x16x16xf32>
    tpu.vector_store %arg9[%c0_72, %c2_73, %c2_74], %50 {strides = array<i32>} : memref<2x20x20xf32, #tpu.memory_space<vmem>>, vector<2x16x16xf32>,
    %c0_75 = arith.constant 0 : index
    %c0_76 = arith.constant 0 : index
    %c0_77 = arith.constant 0 : index
    %59 = vector.load %arg9[%c0_75, %c0_76, %c0_77] : memref<2x20x20xf32, #tpu.memory_space<vmem>>, vector<2x20x16xf32>
    %c0_78 = arith.constant 0 : index
    %c0_79 = arith.constant 0 : index
    %c1_80 = arith.constant 1 : index
    %60 = vector.load %arg9[%c0_78, %c0_79, %c1_80] : memref<2x20x20xf32, #tpu.memory_space<vmem>>, vector<2x20x16xf32>
    %61 = arith.maximumf %59, %60 : vector<2x20x16xf32>
    %c0_81 = arith.constant 0 : index
    %c0_82 = arith.constant 0 : index
    %c2_83 = arith.constant 2 : index
    %62 = vector.load %arg9[%c0_81, %c0_82, %c2_83] : memref<2x20x20xf32, #tpu.memory_space<vmem>>, vector<2x20x16xf32>
    %63 = arith.maximumf %61, %62 : vector<2x20x16xf32>
    %c0_84 = arith.constant 0 : index
    %c0_85 = arith.constant 0 : index
    %c3_86 = arith.constant 3 : index
    %64 = vector.load %arg9[%c0_84, %c0_85, %c3_86] : memref<2x20x20xf32, #tpu.memory_space<vmem>>, vector<2x20x16xf32>
    %65 = arith.maximumf %63, %64 : vector<2x20x16xf32>
    %c0_87 = arith.constant 0 : index
    %c0_88 = arith.constant 0 : index
    %c4_89 = arith.constant 4 : index
    %66 = vector.load %arg9[%c0_87, %c0_88, %c4_89] : memref<2x20x20xf32, #tpu.memory_space<vmem>>, vector<2x20x16xf32>
    %67 = arith.maximumf %65, %66 : vector<2x20x16xf32>
    %c0_90 = arith.constant 0 : index
    %c0_91 = arith.constant 0 : index
    %c0_92 = arith.constant 0 : index
    %68 = vector.load %arg10[%c0_90, %c0_91, %c0_92] : memref<2x20x16xf32, #tpu.memory_space<vmem>>, vector<2x20x16xf32>
    tpu.vector_store %arg10[%c0_90, %c0_91, %c0_92], %67 {strides = array<i32>} : memref<2x20x16xf32, #tpu.memory_space<vmem>>, vector<2x20x16xf32>,
    %c0_93 = arith.constant 0 : index
    %c0_94 = arith.constant 0 : index
    %c0_95 = arith.constant 0 : index
    %69 = vector.load %arg10[%c0_93, %c0_94, %c0_95] : memref<2x20x16xf32, #tpu.memory_space<vmem>>, vector<2x16x16xf32>
    %c0_96 = arith.constant 0 : index
    %c1_97 = arith.constant 1 : index
    %c0_98 = arith.constant 0 : index
    %70 = vector.load %arg10[%c0_96, %c1_97, %c0_98] : memref<2x20x16xf32, #tpu.memory_space<vmem>>, vector<2x16x16xf32>
    %71 = arith.maximumf %69, %70 : vector<2x16x16xf32>
    %c0_99 = arith.constant 0 : index
    %c2_100 = arith.constant 2 : index
    %c0_101 = arith.constant 0 : index
    %72 = vector.load %arg10[%c0_99, %c2_100, %c0_101] : memref<2x20x16xf32, #tpu.memory_space<vmem>>, vector<2x16x16xf32>
    %73 = arith.maximumf %71, %72 : vector<2x16x16xf32>
    %c0_102 = arith.constant 0 : index
    %c3_103 = arith.constant 3 : index
    %c0_104 = arith.constant 0 : index
    %74 = vector.load %arg10[%c0_102, %c3_103, %c0_104] : memref<2x20x16xf32, #tpu.memory_space<vmem>>, vector<2x16x16xf32>
    %75 = arith.maximumf %73, %74 : vector<2x16x16xf32>
    %c0_105 = arith.constant 0 : index
    %c4_106 = arith.constant 4 : index
    %c0_107 = arith.constant 0 : index
    %76 = vector.load %arg10[%c0_105, %c4_106, %c0_107] : memref<2x20x16xf32, #tpu.memory_space<vmem>>, vector<2x16x16xf32>
    %77 = arith.maximumf %75, %76 : vector<2x16x16xf32>
    %c0_108 = arith.constant 0 : index
    %c0_109 = arith.constant 0 : index
    %78 = vector.load %arg11[%c0_108, %c0_109] : memref<4x256xf32, #tpu.memory_space<vmem>>, vector<4x256xf32>
    %c2_110 = arith.constant 2 : index
    %c0_111 = arith.constant 0 : index
    %c0_112 = arith.constant 0 : index
    %79 = vector.load %arg5[%c2_110, %c0_111, %c0_112] : memref<4x4x2xf32, #tpu.memory_space<vmem>>, vector<1x4x2xf32>
    %80 = vector.shape_cast %79 : vector<1x4x2xf32> to vector<4x2xf32>
    %81 = vector.shape_cast %77 : vector<2x16x16xf32> to vector<2x256xf32>
    %cst_113 = arith.constant dense<0.000000e+00> : vector<4x256xf32>
    %82 = tpu.matmul %80, %81, %cst_113 {dimension_numbers = #tpu.dot_dimension_numbers<[1], [0], [0], [1], [0, 0, 1, 1], [], []>} : vector<4x2xf32>, vector<2x256xf32>, vector<4x256xf32> -> vector<4x256xf32>
    %83 = arith.addf %78, %82 : vector<4x256xf32>
    %c0_114 = arith.constant 0 : index
    %c0_115 = arith.constant 0 : index
    %84 = vector.load %arg11[%c0_114, %c0_115] : memref<4x256xf32, #tpu.memory_space<vmem>>, vector<4x256xf32>
    tpu.vector_store %arg11[%c0_114, %c0_115], %83 {strides = array<i32>} : memref<4x256xf32, #tpu.memory_space<vmem>>, vector<4x256xf32>,
    %c0_116 = arith.constant 0 : index
    %c2_117 = arith.constant 2 : index
    %c2_118 = arith.constant 2 : index
    %85 = vector.load %arg9[%c0_116, %c2_117, %c2_118] : memref<2x20x20xf32, #tpu.memory_space<vmem>>, vector<2x16x16xf32>
    tpu.vector_store %arg9[%c0_116, %c2_117, %c2_118], %77 {strides = array<i32>} : memref<2x20x20xf32, #tpu.memory_space<vmem>>, vector<2x16x16xf32>,
    %c0_119 = arith.constant 0 : index
    %c0_120 = arith.constant 0 : index
    %c0_121 = arith.constant 0 : index
    %86 = vector.load %arg9[%c0_119, %c0_120, %c0_121] : memref<2x20x20xf32, #tpu.memory_space<vmem>>, vector<2x20x16xf32>
    %c0_122 = arith.constant 0 : index
    %c0_123 = arith.constant 0 : index
    %c1_124 = arith.constant 1 : index
    %87 = vector.load %arg9[%c0_122, %c0_123, %c1_124] : memref<2x20x20xf32, #tpu.memory_space<vmem>>, vector<2x20x16xf32>
    %88 = arith.maximumf %86, %87 : vector<2x20x16xf32>
    %c0_125 = arith.constant 0 : index
    %c0_126 = arith.constant 0 : index
    %c2_127 = arith.constant 2 : index
    %89 = vector.load %arg9[%c0_125, %c0_126, %c2_127] : memref<2x20x20xf32, #tpu.memory_space<vmem>>, vector<2x20x16xf32>
    %90 = arith.maximumf %88, %89 : vector<2x20x16xf32>
    %c0_128 = arith.constant 0 : index
    %c0_129 = arith.constant 0 : index
    %c3_130 = arith.constant 3 : index
    %91 = vector.load %arg9[%c0_128, %c0_129, %c3_130] : memref<2x20x20xf32, #tpu.memory_space<vmem>>, vector<2x20x16xf32>
    %92 = arith.maximumf %90, %91 : vector<2x20x16xf32>
    %c0_131 = arith.constant 0 : index
    %c0_132 = arith.constant 0 : index
    %c4_133 = arith.constant 4 : index
    %93 = vector.load %arg9[%c0_131, %c0_132, %c4_133] : memref<2x20x20xf32, #tpu.memory_space<vmem>>, vector<2x20x16xf32>
    %94 = arith.maximumf %92, %93 : vector<2x20x16xf32>
    %c0_134 = arith.constant 0 : index
    %c0_135 = arith.constant 0 : index
    %c0_136 = arith.constant 0 : index
    %95 = vector.load %arg10[%c0_134, %c0_135, %c0_136] : memref<2x20x16xf32, #tpu.memory_space<vmem>>, vector<2x20x16xf32>
    tpu.vector_store %arg10[%c0_134, %c0_135, %c0_136], %94 {strides = array<i32>} : memref<2x20x16xf32, #tpu.memory_space<vmem>>, vector<2x20x16xf32>,
    %c0_137 = arith.constant 0 : index
    %c0_138 = arith.constant 0 : index
    %c0_139 = arith.constant 0 : index
    %96 = vector.load %arg10[%c0_137, %c0_138, %c0_139] : memref<2x20x16xf32, #tpu.memory_space<vmem>>, vector<2x16x16xf32>
    %c0_140 = arith.constant 0 : index
    %c1_141 = arith.constant 1 : index
    %c0_142 = arith.constant 0 : index
    %97 = vector.load %arg10[%c0_140, %c1_141, %c0_142] : memref<2x20x16xf32, #tpu.memory_space<vmem>>, vector<2x16x16xf32>
    %98 = arith.maximumf %96, %97 : vector<2x16x16xf32>
    %c0_143 = arith.constant 0 : index
    %c2_144 = arith.constant 2 : index
    %c0_145 = arith.constant 0 : index
    %99 = vector.load %arg10[%c0_143, %c2_144, %c0_145] : memref<2x20x16xf32, #tpu.memory_space<vmem>>, vector<2x16x16xf32>
    %100 = arith.maximumf %98, %99 : vector<2x16x16xf32>
    %c0_146 = arith.constant 0 : index
    %c3_147 = arith.constant 3 : index
    %c0_148 = arith.constant 0 : index
    %101 = vector.load %arg10[%c0_146, %c3_147, %c0_148] : memref<2x20x16xf32, #tpu.memory_space<vmem>>, vector<2x16x16xf32>
    %102 = arith.maximumf %100, %101 : vector<2x16x16xf32>
    %c0_149 = arith.constant 0 : index
    %c4_150 = arith.constant 4 : index
    %c0_151 = arith.constant 0 : index
    %103 = vector.load %arg10[%c0_149, %c4_150, %c0_151] : memref<2x20x16xf32, #tpu.memory_space<vmem>>, vector<2x16x16xf32>
    %104 = arith.maximumf %102, %103 : vector<2x16x16xf32>
    %c0_152 = arith.constant 0 : index
    %c0_153 = arith.constant 0 : index
    %105 = vector.load %arg11[%c0_152, %c0_153] : memref<4x256xf32, #tpu.memory_space<vmem>>, vector<4x256xf32>
    %c3_154 = arith.constant 3 : index
    %c0_155 = arith.constant 0 : index
    %c0_156 = arith.constant 0 : index
    %106 = vector.load %arg5[%c3_154, %c0_155, %c0_156] : memref<4x4x2xf32, #tpu.memory_space<vmem>>, vector<1x4x2xf32>
    %107 = vector.shape_cast %106 : vector<1x4x2xf32> to vector<4x2xf32>
    %108 = vector.shape_cast %104 : vector<2x16x16xf32> to vector<2x256xf32>
    %cst_157 = arith.constant dense<0.000000e+00> : vector<4x256xf32>
    %109 = tpu.matmul %107, %108, %cst_157 {dimension_numbers = #tpu.dot_dimension_numbers<[1], [0], [0], [1], [0, 0, 1, 1], [], []>} : vector<4x2xf32>, vector<2x256xf32>, vector<4x256xf32> -> vector<4x256xf32>
    %110 = arith.addf %105, %109 : vector<4x256xf32>
    %c0_158 = arith.constant 0 : index
    %c0_159 = arith.constant 0 : index
    %111 = vector.load %arg11[%c0_158, %c0_159] : memref<4x256xf32, #tpu.memory_space<vmem>>, vector<4x256xf32>
    tpu.vector_store %arg11[%c0_158, %c0_159], %110 {strides = array<i32>} : memref<4x256xf32, #tpu.memory_space<vmem>>, vector<4x256xf32>,
    %c0_160 = arith.constant 0 : index
    %c0_161 = arith.constant 0 : index
    %112 = vector.load %arg11[%c0_160, %c0_161] : memref<4x256xf32, #tpu.memory_space<vmem>>, vector<4x256xf32>
    %c0_162 = arith.constant 0 : index
    %c0_163 = arith.constant 0 : index
    %113 = vector.load %arg6[%c0_162, %c0_163] : memref<4x1xf32, #tpu.memory_space<vmem>>, vector<4x1xf32>
    %114 = vector.broadcast %113 : vector<4x1xf32> to vector<4x256xf32>
    %115 = arith.mulf %112, %114 : vector<4x256xf32>
    %c0_164 = arith.constant 0 : index
    %c0_165 = arith.constant 0 : index
    %116 = vector.load %arg7[%c0_164, %c0_165] : memref<4x1xf32, #tpu.memory_space<vmem>>, vector<4x1xf32>
    %117 = vector.broadcast %116 : vector<4x1xf32> to vector<4x256xf32>
    %118 = arith.addf %115, %117 : vector<4x256xf32>
    %cst_166 = arith.constant 0.000000e+00 : f32
    %119 = vector.broadcast %cst_166 : f32 to vector<4x256xf32>
    %120 = arith.subf %119, %118 : vector<4x256xf32>
    %121 = math.exp %120 : vector<4x256xf32>
    %cst_167 = arith.constant 1.000000e+00 : f32
    %122 = vector.broadcast %cst_167 : f32 to vector<4x256xf32>
    %123 = arith.addf %122, %121 : vector<4x256xf32>
    %cst_168 = arith.constant 1.000000e+00 : f32
    %124 = vector.broadcast %cst_168 : f32 to vector<4x256xf32>
    %125 = arith.divf %124, %123 : vector<4x256xf32>
    %126 = arith.mulf %118, %125 : vector<4x256xf32>
    %c0_169 = arith.constant 0 : index
    %c0_170 = arith.constant 0 : index
    %c0_171 = arith.constant 0 : index
    %127 = vector.load %arg8[%c0_169, %c0_170, %c0_171] : memref<1x4x256xf32, #tpu.memory_space<vmem>>, vector<1x4x256xf32>
    %128 = vector.shape_cast %127 : vector<1x4x256xf32> to vector<4x256xf32>
    %129 = vector.shape_cast %126 : vector<4x256xf32> to vector<1x4x256xf32>
    tpu.vector_store %arg8[%c0_169, %c0_170, %c0_171], %129 {strides = array<i32>} : memref<1x4x256xf32, #tpu.memory_space<vmem>>, vector<1x4x256xf32>,
    return
  }
  func.func @transform_0(%arg0: i32) -> (i32, i32, i32) {
    %c0_i32 = arith.constant 0 : i32
    %c0_i32_0 = arith.constant 0 : i32
    %c0_i32_1 = arith.constant 0 : i32
    return %arg0, %c0_i32, %c0_i32_0 : i32, i32, i32
  }
  func.func @transform_1(%arg0: i32) -> (i32, i32) {
    %c0_i32 = arith.constant 0 : i32
    %c0_i32_0 = arith.constant 0 : i32
    %c0_i32_1 = arith.constant 0 : i32
    return %c0_i32, %c0_i32_0 : i32, i32
  }
  func.func @transform_2(%arg0: i32) -> (i32, i32) {
    %c0_i32 = arith.constant 0 : i32
    %c0_i32_0 = arith.constant 0 : i32
    %c0_i32_1 = arith.constant 0 : i32
    return %c0_i32, %c0_i32_0 : i32, i32
  }
  func.func @transform_3(%arg0: i32) -> (i32, i32) {
    %c0_i32 = arith.constant 0 : i32
    %c0_i32_0 = arith.constant 0 : i32
    %c0_i32_1 = arith.constant 0 : i32
    return %c0_i32, %c0_i32_0 : i32, i32
  }
  func.func @transform_4(%arg0: i32) -> (i32, i32, i32) {
    %c0_i32 = arith.constant 0 : i32
    %c0_i32_0 = arith.constant 0 : i32
    %c0_i32_1 = arith.constant 0 : i32
    %c0_i32_2 = arith.constant 0 : i32
    return %c0_i32, %c0_i32_0, %c0_i32_1 : i32, i32, i32
  }
  func.func @transform_5(%arg0: i32) -> (i32, i32) {
    %c0_i32 = arith.constant 0 : i32
    %c0_i32_0 = arith.constant 0 : i32
    %c0_i32_1 = arith.constant 0 : i32
    return %c0_i32, %c0_i32_0 : i32, i32
  }
  func.func @transform_6(%arg0: i32) -> (i32, i32) {
    %c0_i32 = arith.constant 0 : i32
    %c0_i32_0 = arith.constant 0 : i32
    %c0_i32_1 = arith.constant 0 : i32
    return %c0_i32, %c0_i32_0 : i32, i32
  }
  func.func @transform_7(%arg0: i32) -> (i32, i32, i32) {
    %c0_i32 = arith.constant 0 : i32
    %c0_i32_0 = arith.constant 0 : i32
    %c0_i32_1 = arith.constant 0 : i32
    return %arg0, %c0_i32, %c0_i32_0 : i32, i32, i32
  }
}

</mosaic_0001>

<bundles_post_ra>
// kernel: tpu_custom_call.1
= control target key start
LH: loop header
LB: loop body
LE: loop exit
PB: predicated region body
PF: predicated region fallthrough
CT: control target
= control target key end

     0   :  { %12 = vsyncpa [#allocation6], 0  ;;  %s3047_s0 = inlined_call_operand.vmem [shape: f32[2,4,256], index: 0, kind: input, shape index: {}]   ;;  %s3048_s1 = inlined_call_operand.vmem [shape: f32[2,4], index: 1, kind: input, shape index: {}]   ;;  %s3049_s2 = inlined_call_operand.vmem [shape: f32[2,1], index: 2, kind: input, shape index: {}]   ;;  %s3050_s3 = inlined_call_operand.vmem [shape: f32[2,1], index: 3, kind: input, shape index: {}]   ;;  %s3051_s4 = inlined_call_operand.vmem [shape: f32[4,4,2], index: 4, kind: input, shape index: {}]   ;;  %s3052_s5 = inlined_call_operand.vmem [shape: f32[4,1], index: 5, kind: input, shape index: {}]   ;;  %s3053_s6 = inlined_call_operand.vmem [shape: f32[4,1], index: 6, kind: input, shape index: {}]   ;;  %s3054_s7 = inlined_call_operand.hbm [shape: f32[2,4,256], index: 7, kind: output, shape index: {}]  }
   0x1   :  { %14 = vsyncpa [#allocation6 + $0x1], 0  ;;  %s2369_s24 = smov 0   ;;  %s2371_s25 = smov 0  }
   0x2   :  { %s2373_s26 = smov 0   ;;  %s2375_s27 = smov 0  }
   0x3 LB: > { %s2390_s28 = sadd.s32 4294967295, %s2308_s27   ;;  %s2144_s29 = sadd.s32 4294967294, %s2308_s27   ;;  %s2308_s27 = sphi %s2375_s27, %s3060_s27   ;;  %s2304_s26 = sphi %s2373_s26, %s3059_s26   ;;  %s2300_s25 = sphi %s2371_s25, %s3058_s25   ;;  %s2296_s24 = sphi %s2369_s24, %s3057_s24  }
   0x4   : > { %s2394_s30 = sadd.s32 1, %s2308_s27   ;;  %s179_s8 = sadd.s32 1, %s2304_s26 }
   0x5   : > { %s176_s9 = ssub.s32 %s2308_s27, %s2394_s30  ;;  %p189_p0 = scmp.ne.s32.totalorder %s2304_s26, %s2300_s25 }
   0x6   : > { %p177_p1 = scmp.eq.s32.totalorder %s176_s9, 0  ;;  %p190_p2 = scmp.eq.s32.totalorder %s2390_s28, 1 }
   0x7   : > { %p195_p3 = scmp.ne.s32.totalorder %s2300_s25, %s2296_s24  ;;  %p196_p4 = scmp.eq.s32.totalorder %s2144_s29, 1 }
   0x8   : > { %s2405_s10 = scalar_select %p177_p1, %s2304_s26, %s179_s8  }
   0x9   : > { %p2407_p5 = por %p190_p2, %p189_p0  ;;  %p2411_p6 = por %p196_p4, %p195_p3 }
   0xa   : > { %p2147_p7 = scmp.ge.s32.totalorder %s2308_s27, 1  ;;  %p240_p8 = scmp.lt.s32.totalorder %s2308_s27, 3 }
   0xc   : > { %p241_p9 = pnand %p2147_p7, %p240_p8 }
   0xd   : > { %p272_p10 = scmp.lt.s32.totalorder (!%p241_p9), %s2390_s28, 1  ;;  %s2312_s29 = smov (!%p241_p9), 80  }
   0xe   : > { %244 = sbr.rel (%p241_p9) target bundleno = 1696 (0x6a0), region = 48  ;;  %s2313_s8 = smov (!%p241_p9), 112  }
   0xf   : > { %s2314_s9 = smov (!%p241_p9), 48   ;;  %s2315_s13 = smov (!%p241_p9), 96  }
  0x10   : > { %s2316_s14 = smov (!%p241_p9), 16   ;;  %s2322_s17 = smov (!%p241_p9), 2  }
  0x11   : > { %s2323_s18 = smov (!%p241_p9), 127   ;;  %s2324_s19 = smov (!%p241_p9), 126  }
  0x12   : > { %s2325_s20 = smov (!%p241_p9), 125   ;;  %s2175_s22 = sshll.u32 (!%p241_p9), %s2390_s28, 7 }
  0x13   : > { %v2310_v0 = vmov 0.0   ;;  %v361_v1 = vld [vmem:[%s3049_s2] sm:$0x3]  ;;  %s273_s15 = scalar_select %p272_p10, %s2390_s28, 1  ;;  %v2311_v2 = vmov 0   ;;  %vm285_vm0 = vcmask 1043456   ;;  %v545_v32 = vlaneseq }
  0x14   : > { %354 = vmatprep.mubr.f32.mxu0 %v2310_v0  ;;  %467 = vmatprep.mubr.f32.mxu1 %v2310_v0  ;;  %v369_v3 = vld [vmem:[%s3050_s3] sm:$0x3]  ;;  %vm281_vm1 = vcmask 31744   ;;  %vm396_vm2 = vcmask 1041408   ;;  %vm392_vm3 = vcmask 15360   ;;  %vm479_vm4 = vcmask 156672  }
  0x15   : > { %2233 = vset.pattern.permute.xlu0 %v2311_v2  ;;  %2234 = vset.pattern.permute.xlu1 %v2311_v2  ;;  %s2174_s16 = sshll.u32 %s273_s15, 3  ;;  %v277_v6 = vld [vmem:[%s3048_s1] sm:$0x3]  ;;  %s2317_s15 = smov 64   ;;  %vm491_vm5 = vcmask 162960   ;;  %v2319_v27 = vmov -inf  }
  0x16   : > { %364 = vperm.xlu0 %2233, %v361_v1   ;;  %s276_s21 = scalar_lea.vmem %s3047_s0, %s2174_s16  ;;  %s2318_s16 = smov 32   ;;  %480 = vst.msk [vmem:[#allocation2] sm:$0x3] %vm479_vm4, %v2319_v27  ;;  %481 = vst.msk [vmem:[#allocation2 + $0x18] sm:$0x3] %vm479_vm4, %v2319_v27  ;;  %v2464_v36 = vshrl.u32 %v545_v32, 7 }
  0x17   : > { %v278_v4 = vld [vmem:[%s276_s21] sm:$0xff]  ;;  %485 = vst.msk [vmem:[#allocation2 + $0x8] sm:$0xff] %vm392_vm3, %v2319_v27  ;;  %489 = vst.msk [vmem:[#allocation2 + $0x20] sm:$0xff] %vm392_vm3, %v2319_v27  ;;  %v2320_v30 = vmov 1983009808   ;;  %vm486_vm6 = vcmask 11264  }
  0x18   : > { %v280_v5 = vcombine.high %v278_v4, %v278_v4  ;;  %482 = vst.msk [vmem:[#allocation2 + $0x12] sm:$0x3] %vm479_vm4, %v2319_v27  ;;  %483 = vst.msk [vmem:[#allocation2 + $0x2a] sm:$0x3] %vm479_vm4, %v2319_v27  ;;  %v543_v31 = vunpack.c.l.s4 %v2320_v30  ;;  %v2321_v38 = vmov 1934713408  }
  0x19   : > { %484 = vst.msk [vmem:[#allocation2] sm:$0xff] %vm392_vm3, %v2319_v27  ;;  %488 = vst.msk [vmem:[#allocation2 + $0x18] sm:$0xff] %vm392_vm3, %v2319_v27  ;;  %v575_v39 = vunpack.c.l.s4 %v2321_v38  ;;  %vm494_vm7 = vcmask 158864   ;;  %vm657_vm8 = vcmask 146448   ;;  %s2326_s21 = smov 124   ;;  %vm770_vm9 = vcmask 130048  }
  0x1a   : > { %372 = vperm.xlu0 %2233, %v369_v3   ;;  %2151 = vmatprep.subr.msk.mxu0 %vm285_vm0, %v280_v5  ;;  %493 = vst.msk [vmem:[#allocation2 + $0x8] sm:$0xff] %vm491_vm5, %v2319_v27  ;;  %497 = vst.msk [vmem:[#allocation2 + $0x20] sm:$0xff] %vm491_vm5, %v2319_v27  ;;  %v544_v35 = vunpack.c.0.s8 %v543_v31  ;;  %vm773_vm10 = vcmask 125952   ;;  %vm1006_vm11 = vcmask 261120   ;;  %vm1008_vm12 = vcmask 392192  }
  0x1b   : > { %2152 = vmatpush1.msk.msra.mxu0 %vm285_vm0, %v278_v4  ;;  %492 = vst.msk [vmem:[#allocation2] sm:$0xff] %vm491_vm5, %v2319_v27  ;;  %496 = vst.msk [vmem:[#allocation2 + $0x18] sm:$0xff] %vm491_vm5, %v2319_v27  ;;  %v576_v46 = vunpack.c.0.s8 %v575_v39  ;;  %vm1010_vm13 = vcmask 523264   ;;  %vm1012_vm14 = vcmask 654336   ;;  %vm1014_vm15 = vcmask 785408  }
  0x1c   : > { %2153 = vmatmul.mubr.msk.f32.vlgmr.msra.gmra.mxu0 %vm281_vm1, %v277_v6  ;;  %v2467_v42 = vsub.s32 %v544_v35, %v2464_v36  ;;  %487 = vst.msk [vmem:[#allocation2 + $0x10] sm:$0xf] %vm486_vm6, %v2319_v27  ;;  %490 = vst.msk [vmem:[#allocation2 + $0x28] sm:$0xf] %vm486_vm6, %v2319_v27  ;;  %vm1016_vm0 = vcmask 916480  }
  0x1d   : > { %1098 = vmatprep.mubr.f32.mxu0 %v2310_v0  ;;  %v2474_v54 = vsub.s32 %v576_v46, %v2464_v36  ;;  %495 = vst.msk [vmem:[#allocation2 + $0x10] sm:$0xf] %vm494_vm7, %v2319_v27  ;;  %498 = vst.msk [vmem:[#allocation2 + $0x28] sm:$0xf] %vm494_vm7, %v2319_v27 }
  0x91   : > { %v365_v7 = vpop.permute.xlu0 %364 }
  0x95   : > { %v373_v10 = vpop.permute.xlu0 %372 }
  0xdc   : > { %v356_v8 = vpop.f32.mrf.mxu0 }
  0xdd   : > { %v367_v9 = vmul.f32 %v365_v7, %v356_v8 }
  0xde   : > { %v358_v11 = vpop.f32.mrf.mxu0 }
  0xdf   : > { %v375_v12 = vadd.f32 %v373_v10, %v367_v9  ;;  %v368_v13 = vmul.f32 %v365_v7, %v358_v11 }
  0xe1   : > { %v377_v14 = vsub.f32 0.0, %v375_v12  ;;  %v376_v15 = vadd.f32 %v373_v10, %v368_v13 }
  0xe3   : > { %v379_v16 = vmul.f32 1.442695, %v377_v14  ;;  %v378_v17 = vsub.f32 0.0, %v376_v15 }
  0xe5   : > { %2236 = vpow2.f32 %v379_v16  ;;  %v381_v18 = vmul.f32 1.442695, %v378_v17 }
  0xe7   : > { %2238 = vpow2.f32 %v381_v18 }
  0xf2   : > { %v2237_v19 = vpop.eup %2236 }
  0xf3   : > { %v383_v20 = vadd.f32 1.0, %v2237_v19 }
  0xf4   : > { %v2239_v21 = vpop.eup %2238 }
  0xf5   : > { %2240 = vrcp.f32 %v383_v20  ;;  %v384_v22 = vadd.f32 1.0, %v2239_v21 }
  0xf7   : > { %2242 = vrcp.f32 %v384_v22 }
 0x102   : > { %v2241_v23 = vpop.eup %2240 }
 0x103   : > { %v389_v24 = vmul.f32 %v2241_v23, %v375_v12 }
 0x104   : > { %v2243_v25 = vpop.eup %2242 }
 0x105   : > { %v2434_v26 = vmul.f32 %v2243_v25, %v376_v15  ;;  %505 = vrot.lane.b32.xlu0 %v389_v24, %s2312_s29  ;;  %499 = vrot.lane.b32.xlu1 %v389_v24, %s2313_s8 }
 0x107   : > { %2154 = vmatprep.subr.msk.mxu1 %vm396_vm2, %v2434_v26 }
 0x108   : > { %2155 = vmatpush1.msk.msra.mxu1 %vm396_vm2, %v389_v24 }
 0x109   : > { %511 = vrot.lane.b32.xlu0 %v389_v24, %s2314_s9  ;;  %502 = vrot.lane.b32.xlu1 %v389_v24, %s2315_s13 }
 0x10d   : > { %517 = vrot.lane.b32.xlu0 %v389_v24, %s2316_s14  ;;  %508 = vrot.lane.b32.xlu1 %v389_v24, %s2317_s15 }
 0x111   : > { %514 = vrot.lane.b32.xlu1 %v389_v24, %s2318_s16  ;;  %523 = vrot.lane.b32.xlu0 %v2434_v26, %s2315_s13 }
 0x115   : > { %529 = vrot.lane.b32.xlu0 %v2434_v26, %s2317_s15  ;;  %520 = vrot.lane.b32.xlu1 %v2434_v26, %s2313_s8 }
 0x119   : > { %535 = vrot.lane.b32.xlu0 %v2434_v26, %s2318_s16  ;;  %526 = vrot.lane.b32.xlu1 %v2434_v26, %s2312_s29 }
 0x11d   : > { %532 = vrot.lane.b32.xlu1 %v2434_v26, %s2314_s9 }
 0x121   : > { %538 = vrot.lane.b32.xlu1 %v2434_v26, %s2316_s14 }
 0x177   : > { %v506_v28 = vpop.permute.xlu0 %505  ;;  %v500_v29 = vpop.permute.xlu1 %499 }
 0x178   : > { %v549_v43 = vcombine.low %v500_v29, %v506_v28 }
 0x17a   : > { %v556_v49 = vrot.slane %v549_v43, %v2467_v42 }
 0x17b   : > { %v512_v33 = vpop.permute.xlu0 %511  ;;  %v503_v34 = vpop.permute.xlu1 %502 }
 0x17c   : > { %v541_v37 = vcombine.low %v389_v24, %v503_v34 }
 0x17e   : > { %v548_v44 = vrot.slane %v541_v37, %v2467_v42 }
 0x17f   : > { %v518_v40 = vpop.permute.xlu0 %517  ;;  %v509_v41 = vpop.permute.xlu1 %508 }
 0x180   : > { %v565_v45 = vcombine.low %v512_v33, %v518_v40  ;;  %v573_v51 = vcombine.low %v548_v44, %v556_v49 }
 0x182   : > { %v572_v52 = vrot.slane %v565_v45, %v2467_v42  ;;  %v580_v58 = vrot.slane %v573_v51, %v2474_v54 }
 0x183   : > { %v515_v47 = vpop.permute.xlu1 %514  ;;  %v524_v48 = vpop.permute.xlu0 %523 }
 0x184   : > { %v557_v50 = vcombine.low %v509_v41, %v515_v47  ;;  %v591_v2 = vcombine.low %v2434_v26, %v524_v48 }
 0x186   : > { %v564_v53 = vrot.slane %v557_v50, %v2467_v42  ;;  %v598_v7 = vrot.slane %v591_v2, %v2467_v42 }
 0x187   : > { %v521_v55 = vpop.permute.xlu1 %520  ;;  %v530_v57 = vpop.permute.xlu0 %529 }
 0x188   : > { %v581_v56 = vcombine.low %v564_v53, %v572_v52 }
 0x18a   : > { %v588_v59 = vrot.slane %v581_v56, %v2474_v54 }
 0x18b   : > { %v527_v60 = vpop.permute.xlu1 %526  ;;  %v536_v63 = vpop.permute.xlu0 %535 }
 0x18c   : > { %v589_v61 = vcombine.low %v580_v58, %v588_v59  ;;  %v599_v62 = vcombine.low %v521_v55, %v527_v60  ;;  %v590_v3 = vcombine.high %v580_v58, %v588_v59  ;;  %v607_v4 = vcombine.low %v530_v57, %v536_v63 }
 0x18e   : > { %645 = vrot.lane.b32.xlu0 %v589_v61, %s2322_s17  ;;  %v606_v5 = vrot.slane %v599_v62, %v2467_v42  ;;  %v614_v9 = vrot.slane %v607_v4, %v2467_v42 }
 0x18f   : > { %v533_v1 = vpop.permute.xlu1 %532 }
 0x190   : > { %v623_v10 = vcombine.low %v598_v7, %v606_v5 }
 0x192   : > { %649 = vrot.lane.b32.xlu0 %v590_v3, %s2322_s17  ;;  %v630_v13 = vrot.slane %v623_v10, %v2474_v54 }
 0x193   : > { %v539_v6 = vpop.permute.xlu1 %538 }
 0x194   : > { %v615_v8 = vcombine.low %v533_v1, %v539_v6 }
 0x196   : > { %v622_v11 = vrot.slane %v615_v8, %v2467_v42 }
 0x198   : > { %v631_v12 = vcombine.low %v614_v9, %v622_v11 }
 0x19a   : > { %v638_v14 = vrot.slane %v631_v12, %v2474_v54 }
 0x19c   : > { %v639_v15 = vcombine.low %v630_v13, %v638_v14  ;;  %v640_v16 = vcombine.high %v630_v13, %v638_v14 }
 0x19e   : > { %647 = vrot.lane.b32.xlu1 %v639_v15, %s2322_s17 }
 0x1a2   : > { %651 = vrot.lane.b32.xlu1 %v640_v16, %s2322_s17 }
 0x200   : > { %v646_v17 = vpop.permute.xlu0 %645 }
 0x201   : > { %658 = vst.msk [vmem:[#allocation2 + $0x2] sm:$0xff] %vm657_vm8, %v646_v17 }
 0x204   : > { %v650_v18 = vpop.permute.xlu0 %649 }
 0x205   : > { %660 = vst.msk [vmem:[#allocation2 + $0x1a] sm:$0xff] %vm657_vm8, %v650_v18 }
 0x208   : > { %v662_v19 = vld [vmem:[#allocation2] sm:$0xff] }
 0x209   : > { %674 = vrot.lane.b32.xlu0 %v662_v19, %s2323_s18 }
 0x20c   : > { %v665_v20 = vld [vmem:[#allocation2 + $0x18] sm:$0xff] }
 0x20d   : > { %698 = vrot.lane.b32.xlu0 %v662_v19, %s2324_s19  ;;  %680 = vrot.lane.b32.xlu1 %v665_v20, %s2323_s18 }
 0x210   : > { %v648_v21 = vpop.permute.xlu1 %647 }
 0x211   : > { %659 = vst.msk [vmem:[#allocation2 + $0xa] sm:$0xff] %vm657_vm8, %v648_v21  ;;  %722 = vrot.lane.b32.xlu0 %v662_v19, %s2325_s20  ;;  %704 = vrot.lane.b32.xlu1 %v665_v20, %s2324_s19 }
 0x214   : > { %v652_v22 = vpop.permute.xlu1 %651 }
 0x215   : > { %661 = vst.msk [vmem:[#allocation2 + $0x22] sm:$0xff] %vm657_vm8, %v652_v22  ;;  %746 = vrot.lane.b32.xlu0 %v662_v19, %s2326_s21  ;;  %728 = vrot.lane.b32.xlu1 %v665_v20, %s2325_s20 }
 0x218   : > { %v664_v23 = vld [vmem:[#allocation2 + $0x10] sm:$0xf]  ;;  %v663_v24 = vld [vmem:[#allocation2 + $0x8] sm:$0xff] }
 0x219   : > { %752 = vrot.lane.b32.xlu1 %v665_v20, %s2326_s21  ;;  %678 = vrot.lane.b32.xlu0 %v664_v23, %s2323_s18 }
 0x21c   : > { %v666_v25 = vld [vmem:[#allocation2 + $0x20] sm:$0xff]  ;;  %v667_v26 = vld [vmem:[#allocation2 + $0x28] sm:$0xf] }
 0x21d   : > { %676 = vrot.lane.b32.xlu1 %v663_v24, %s2323_s18  ;;  %682 = vrot.lane.b32.xlu0 %v666_v25, %s2323_s18 }
 0x221   : > { %684 = vrot.lane.b32.xlu1 %v667_v26, %s2323_s18  ;;  %702 = vrot.lane.b32.xlu0 %v664_v23, %s2324_s19 }
 0x225   : > { %700 = vrot.lane.b32.xlu1 %v663_v24, %s2324_s19  ;;  %706 = vrot.lane.b32.xlu0 %v666_v25, %s2324_s19 }
 0x229   : > { %708 = vrot.lane.b32.xlu1 %v667_v26, %s2324_s19  ;;  %726 = vrot.lane.b32.xlu0 %v664_v23, %s2325_s20 }
 0x22d   : > { %724 = vrot.lane.b32.xlu1 %v663_v24, %s2325_s20  ;;  %730 = vrot.lane.b32.xlu0 %v666_v25, %s2325_s20 }
 0x231   : > { %732 = vrot.lane.b32.xlu1 %v667_v26, %s2325_s20  ;;  %750 = vrot.lane.b32.xlu0 %v664_v23, %s2326_s21 }
 0x235   : > { %748 = vrot.lane.b32.xlu1 %v663_v24, %s2326_s21  ;;  %754 = vrot.lane.b32.xlu0 %v666_v25, %s2326_s21 }
 0x239   : > { %756 = vrot.lane.b32.xlu1 %v667_v26, %s2326_s21 }
 0x27b   : > { %v675_v27 = vpop.permute.xlu0 %674 }
 0x27c   : > { %v692_v30 = vmax.f32 %v662_v19, %v675_v27 }
 0x27f   : > { %v699_v28 = vpop.permute.xlu0 %698  ;;  %v681_v29 = vpop.permute.xlu1 %680 }
 0x280   : > { %v716_v33 = vmax.f32 %v692_v30, %v699_v28  ;;  %v695_v34 = vmax.f32 %v665_v20, %v681_v29 }
 0x283   : > { %v723_v31 = vpop.permute.xlu0 %722  ;;  %v705_v32 = vpop.permute.xlu1 %704 }
 0x284   : > { %v740_v35 = vmax.f32 %v716_v33, %v723_v31  ;;  %v719_v39 = vmax.f32 %v695_v34, %v705_v32 }
 0x287   : > { %v747_v37 = vpop.permute.xlu0 %746  ;;  %v729_v38 = vpop.permute.xlu1 %728 }
 0x288   : > { %v764_v40 = vmax.f32 %v740_v35, %v747_v37  ;;  %v743_v41 = vmax.f32 %v719_v39, %v729_v38 }
 0x28a   : > { %771 = vst.msk [vmem:[#allocation3] sm:$0xff] %vm770_vm9, %v764_v40 }
 0x28b   : > { %v679_v43 = vpop.permute.xlu0 %678  ;;  %v753_v44 = vpop.permute.xlu1 %752 }
 0x28c   : > { %v767_v45 = vmax.f32 %v743_v41, %v753_v44  ;;  %v694_v55 = vmax.f32 %v664_v23, %v679_v43 }
 0x28e   : > { %775 = vst.msk [vmem:[#allocation3 + $0x18] sm:$0xff] %vm770_vm9, %v767_v45 }
 0x28f   : > { %v683_v46 = vpop.permute.xlu0 %682  ;;  %v677_v47 = vpop.permute.xlu1 %676 }
 0x290   : > { %v696_v59 = vmax.f32 %v666_v25, %v683_v46  ;;  %v693_v60 = vmax.f32 %v663_v24, %v677_v47 }
 0x291   : > { %v778_v15 = vld [vmem:[#allocation3] sm:$0xff] }
 0x293   : > { %v703_v48 = vpop.permute.xlu0 %702  ;;  %v685_v49 = vpop.permute.xlu1 %684 }
 0x294   : > { %v718_v58 = vmax.f32 %v694_v55, %v703_v48  ;;  %v697_v4 = vmax.f32 %v667_v26, %v685_v49 }
 0x295   : > { %v780_v24 = vld [vmem:[#allocation3 + $0x18] sm:$0xff] }
 0x297   : > { %v707_v50 = vpop.permute.xlu0 %706  ;;  %v701_v51 = vpop.permute.xlu1 %700 }
 0x298   : > { %v720_v1 = vmax.f32 %v696_v59, %v707_v50  ;;  %v717_v2 = vmax.f32 %v693_v60, %v701_v51 }
 0x29b   : > { %v727_v52 = vpop.permute.xlu0 %726  ;;  %v709_v53 = vpop.permute.xlu1 %708 }
 0x29c   : > { %v742_v61 = vmax.f32 %v718_v58, %v727_v52  ;;  %v721_v9 = vmax.f32 %v697_v4, %v709_v53 }
 0x29f   : > { %v731_v56 = vpop.permute.xlu0 %730  ;;  %v725_v57 = vpop.permute.xlu1 %724 }
 0x2a0   : > { %v744_v5 = vmax.f32 %v720_v1, %v731_v56  ;;  %v741_v6 = vmax.f32 %v717_v2, %v725_v57 }
 0x2a3   : > { %v751_v62 = vpop.permute.xlu0 %750  ;;  %v733_v63 = vpop.permute.xlu1 %732 }
 0x2a4   : > { %v766_v3 = vmax.f32 %v742_v61, %v751_v62  ;;  %v745_v12 = vmax.f32 %v721_v9, %v733_v63 }
 0x2a6   : > { %774 = vst.msk [vmem:[#allocation3 + $0x10] sm:$0xf] %vm773_vm10, %v766_v3 }
 0x2a7   : > { %v755_v7 = vpop.permute.xlu0 %754  ;;  %v749_v8 = vpop.permute.xlu1 %748 }
 0x2a8   : > { %v768_v10 = vmax.f32 %v744_v5, %v755_v7  ;;  %v765_v11 = vmax.f32 %v741_v6, %v749_v8 }
 0x2aa   : > { %776 = vst.msk [vmem:[#allocation3 + $0x20] sm:$0xff] %vm770_vm9, %v768_v10  ;;  %772 = vst.msk [vmem:[#allocation3 + $0x8] sm:$0xff] %vm770_vm9, %v765_v11 }
 0x2ab   : > { %v757_v13 = vpop.permute.xlu1 %756 }
 0x2ac   : > { %v769_v14 = vmax.f32 %v745_v12, %v757_v13 }
 0x2ae   : > { %777 = vst.msk [vmem:[#allocation3 + $0x28] sm:$0xf] %vm773_vm10, %v769_v14 }
 0x2b1   : > { %v782_v16 = vld [vmem:[#allocation3 + $0x1] sm:$0xff]  ;;  %v783_v19 = vld [vmem:[#allocation3 + $0x9] sm:$0xff]  ;;  %v784_v25 = vld [vmem:[#allocation3 + $0x19] sm:$0xff] }
 0x2b2   : > { %v786_v17 = vmax.f32 %v778_v15, %v782_v16  ;;  %v779_v18 = vld [vmem:[#allocation3 + $0x8] sm:$0xff]  ;;  %v788_v28 = vmax.f32 %v780_v24, %v784_v25  ;;  %v781_v29 = vld [vmem:[#allocation3 + $0x20] sm:$0xff] }
 0x2b3   : > { %v790_v20 = vld [vmem:[#allocation3 + $0x2] sm:$0xff]  ;;  %v787_v21 = vmax.f32 %v779_v18, %v783_v19  ;;  %v791_v23 = vld [vmem:[#allocation3 + $0xa] sm:$0xff]  ;;  %v792_v33 = vld [vmem:[#allocation3 + $0x1a] sm:$0xff] }
 0x2b4   : > { %v794_v22 = vmax.f32 %v786_v17, %v790_v20  ;;  %v798_v26 = vld [vmem:[#allocation3 + $0x3] sm:$0xff]  ;;  %v799_v32 = vld [vmem:[#allocation3 + $0xb] sm:$0xff]  ;;  %v796_v38 = vmax.f32 %v788_v28, %v792_v33  ;;  %v800_v43 = vld [vmem:[#allocation3 + $0x1b] sm:$0xff] }
 0x2b5   : > { %v795_v27 = vmax.f32 %v787_v21, %v791_v23  ;;  %v785_v30 = vld [vmem:[#allocation3 + $0x21] sm:$0xff]  ;;  %v807_v41 = vld [vmem:[#allocation3 + $0xc] sm:$0xff] }
 0x2b6   : > { %v802_v31 = vmax.f32 %v794_v22, %v798_v26  ;;  %v789_v34 = vmax.f32 %v781_v29, %v785_v30  ;;  %v806_v35 = vld [vmem:[#allocation3 + $0x4] sm:$0xff]  ;;  %v804_v46 = vmax.f32 %v796_v38, %v800_v43  ;;  %v808_v49 = vld [vmem:[#allocation3 + $0x1c] sm:$0xff] }
 0x2b7   : > { %v803_v37 = vmax.f32 %v795_v27, %v799_v32  ;;  %v793_v39 = vld [vmem:[#allocation3 + $0x22] sm:$0xff] }
 0x2b8   : > { %v810_v40 = vmax.f32 %v802_v31, %v806_v35  ;;  %v797_v44 = vmax.f32 %v789_v34, %v793_v39  ;;  %v801_v47 = vld [vmem:[#allocation3 + $0x23] sm:$0xff]  ;;  %v812_v52 = vmax.f32 %v804_v46, %v808_v49 }
 0x2b9   : > { %v811_v45 = vmax.f32 %v803_v37, %v807_v41  ;;  %v809_v53 = vld [vmem:[#allocation3 + $0x24] sm:$0xff] }
 0x2ba   : > { %1115 = vrot.lane.b32.xlu0 %v810_v40, %s2322_s17  ;;  %v817_v48 = vcombine.high %v810_v40, %v2310_v0  ;;  %v805_v50 = vmax.f32 %v797_v44, %v801_v47  ;;  %v2526_v51 = vrot.slane %v810_v40, %v2467_v42  ;;  %v832_v58 = vcombine.high %v812_v52, %v2310_v0 }
 0x2bb   : > { %1117 = vrot.lane.b32.xlu1 %v811_v45, %s2322_s17  ;;  %v883_v55 = vcombine.high %v811_v45, %v2310_v0  ;;  %v2535_v59 = vrot.slane %v812_v52, %v2467_v42  ;;  %v2538_v60 = vrot.slane %v811_v45, %v2467_v42 }
 0x2bc   : > { %v813_v56 = vmax.f32 %v805_v50, %v809_v53  ;;  %v2531_v57 = vrot.slane %v817_v48, %v2467_v42  ;;  %v2546_v63 = vrot.slane %v832_v58, %v2467_v42 }
 0x2bd   : > { %v847_v1 = vcombine.low %v2526_v51, %v2535_v59  ;;  %v848_v2 = vcombine.high %v2526_v51, %v2535_v59  ;;  %v2554_v3 = vrot.slane %v883_v55, %v2467_v42 }
 0x2be   : > { %1119 = vrot.lane.b32.xlu0 %v812_v52, %s2322_s17  ;;  %v898_v61 = vcombine.high %v813_v56, %v2310_v0  ;;  %v2543_v62 = vrot.slane %v813_v56, %v2467_v42  ;;  %v863_v7 = vcombine.low %v2531_v57, %v2546_v63  ;;  %v864_v8 = vcombine.high %v2531_v57, %v2546_v63  ;;  %v391_v57 = vld [vmem:[%s3051_s4] sm:$0xf] }
 0x2bf   : > { %1121 = vrot.lane.b32.xlu1 %v813_v56, %s2322_s17  ;;  %2156 = vmatmul.mubr.msk.f32.vlgmr.msra.gmra.mxu1 %vm392_vm3, %v391_v57 }
 0x2c0   : > { %v2557_v4 = vrot.slane %v898_v61, %v2467_v42  ;;  %v913_v5 = vcombine.low %v2538_v60, %v2543_v62  ;;  %v914_v6 = vcombine.high %v2538_v60, %v2543_v62  ;;  %1559 = vmatprep.mubr.f32.mxu1 %v2310_v0 }
 0x2c2   : > { %v929_v9 = vcombine.low %v2554_v3, %v2557_v4  ;;  %v930_v10 = vcombine.high %v2554_v3, %v2557_v4  ;;  %v878_v3 = vrot.slane %v864_v8, %v2474_v54 }
 0x2c4   : > { %v937_v51 = vrot.slane %v929_v9, %v2474_v54  ;;  %v871_v9 = vrot.slane %v863_v7, %v2474_v54  ;;  %v944_v7 = vrot.slane %v930_v10, %v2474_v54  ;;  %v882_v63 = vcombine.high %v878_v3, %v2310_v0 }
 0x2c6   : > { %v948_v4 = vcombine.high %v944_v7, %v2310_v0 }
 0x32c   : > { %v1116_v11 = vpop.permute.xlu0 %1115 }
 0x32d   : > { %1127 = vst.msk [vmem:[#allocation2 + $0x2] sm:$0xff] %vm657_vm8, %v1116_v11  ;;  %v1118_v12 = vpop.permute.xlu1 %1117 }
 0x32e   : > { %1128 = vst.msk [vmem:[#allocation2 + $0xa] sm:$0xff] %vm657_vm8, %v1118_v12 }
 0x330   : > { %v1120_v13 = vpop.permute.xlu0 %1119 }
 0x331   : > { %1129 = vst.msk [vmem:[#allocation2 + $0x1a] sm:$0xff] %vm657_vm8, %v1120_v13  ;;  %v1122_v14 = vpop.permute.xlu1 %1121 }
 0x332   : > { %1130 = vst.msk [vmem:[#allocation2 + $0x22] sm:$0xff] %vm657_vm8, %v1122_v14 }
 0x334   : > { %v1131_v15 = vld [vmem:[#allocation2] sm:$0xff] }
 0x335   : > { %1143 = vrot.lane.b32.xlu0 %v1131_v15, %s2323_s18  ;;  %v1132_v16 = vld [vmem:[#allocation2 + $0x8] sm:$0xff]  ;;  %v1133_v17 = vld [vmem:[#allocation2 + $0x10] sm:$0xf] }
 0x336   : > { %1145 = vrot.lane.b32.xlu1 %v1132_v16, %s2323_s18 }
 0x338   : > { %v1134_v18 = vld [vmem:[#allocation2 + $0x18] sm:$0xff] }
 0x339   : > { %1147 = vrot.lane.b32.xlu0 %v1133_v17, %s2323_s18  ;;  %v1135_v19 = vld [vmem:[#allocation2 + $0x20] sm:$0xff]  ;;  %v2579_v20 = vld [vmem:[#allocation2 + $0x28] sm:$0xf] }
 0x33a   : > { %1149 = vrot.lane.b32.xlu1 %v1134_v18, %s2323_s18 }
 0x33d   : > { %1151 = vrot.lane.b32.xlu0 %v1135_v19, %s2323_s18 }
 0x33e   : > { %1153 = vrot.lane.b32.xlu1 %v2579_v20, %s2323_s18 }
 0x341   : > { %1167 = vrot.lane.b32.xlu0 %v1131_v15, %s2324_s19 }
 0x342   : > { %1169 = vrot.lane.b32.xlu1 %v1132_v16, %s2324_s19 }
 0x345   : > { %1171 = vrot.lane.b32.xlu0 %v1133_v17, %s2324_s19 }
 0x346   : > { %1173 = vrot.lane.b32.xlu1 %v1134_v18, %s2324_s19 }
 0x349   : > { %1175 = vrot.lane.b32.xlu0 %v1135_v19, %s2324_s19 }
 0x34a   : > { %1177 = vrot.lane.b32.xlu1 %v2579_v20, %s2324_s19 }
 0x34d   : > { %1191 = vrot.lane.b32.xlu0 %v1131_v15, %s2325_s20 }
 0x34e   : > { %1193 = vrot.lane.b32.xlu1 %v1132_v16, %s2325_s20 }
 0x351   : > { %1195 = vrot.lane.b32.xlu0 %v1133_v17, %s2325_s20 }
 0x352   : > { %1197 = vrot.lane.b32.xlu1 %v1134_v18, %s2325_s20 }
 0x355   : > { %1199 = vrot.lane.b32.xlu0 %v1135_v19, %s2325_s20 }
 0x356   : > { %1201 = vrot.lane.b32.xlu1 %v2579_v20, %s2325_s20 }
 0x359   : > { %1215 = vrot.lane.b32.xlu0 %v1131_v15, %s2326_s21 }
 0x35a   : > { %1217 = vrot.lane.b32.xlu1 %v1132_v16, %s2326_s21 }
 0x35d   : > { %1219 = vrot.lane.b32.xlu0 %v1133_v17, %s2326_s21 }
 0x35e   : > { %1221 = vrot.lane.b32.xlu1 %v1134_v18, %s2326_s21 }
 0x361   : > { %1223 = vrot.lane.b32.xlu0 %v1135_v19, %s2326_s21 }
 0x362   : > { %1225 = vrot.lane.b32.xlu1 %v2579_v20, %s2326_s21 }
 0x3a7   : > { %v1144_v21 = vpop.permute.xlu0 %1143 }
 0x3a8   : > { %v1146_v22 = vpop.permute.xlu1 %1145  ;;  %v1161_v38 = vmax.f32 %v1131_v15, %v1144_v21 }
 0x3a9   : > { %v1162_v39 = vmax.f32 %v1132_v16, %v1146_v22 }
 0x3ab   : > { %v1148_v23 = vpop.permute.xlu0 %1147 }
 0x3ac   : > { %v1150_v24 = vpop.permute.xlu1 %1149  ;;  %v1163_v45 = vmax.f32 %v1133_v17, %v1148_v23 }
 0x3ad   : > { %v1164_v47 = vmax.f32 %v1134_v18, %v1150_v24 }
 0x3af   : > { %v1152_v25 = vpop.permute.xlu0 %1151 }
 0x3b0   : > { %v1154_v26 = vpop.permute.xlu1 %1153  ;;  %v1165_v58 = vmax.f32 %v1135_v19, %v1152_v25 }
 0x3b1   : > { %v1166_v11 = vmax.f32 %v2579_v20, %v1154_v26 }
 0x3b3   : > { %v1168_v27 = vpop.permute.xlu0 %1167 }
 0x3b4   : > { %v1170_v28 = vpop.permute.xlu1 %1169  ;;  %v1185_v41 = vmax.f32 %v1161_v38, %v1168_v27 }
 0x3b5   : > { %v1186_v44 = vmax.f32 %v1162_v39, %v1170_v28 }
 0x3b7   : > { %v1172_v29 = vpop.permute.xlu0 %1171 }
 0x3b8   : > { %v1174_v30 = vpop.permute.xlu1 %1173  ;;  %v1187_v50 = vmax.f32 %v1163_v45, %v1172_v29 }
 0x3b9   : > { %v1188_v55 = vmax.f32 %v1164_v47, %v1174_v30 }
 0x3bb   : > { %v1176_v31 = vpop.permute.xlu0 %1175 }
 0x3bc   : > { %v1178_v32 = vpop.permute.xlu1 %1177  ;;  %v1189_v14 = vmax.f32 %v1165_v58, %v1176_v31 }
 0x3bd   : > { %v1190_v17 = vmax.f32 %v1166_v11, %v1178_v32 }
 0x3bf   : > { %v1192_v33 = vpop.permute.xlu0 %1191 }
 0x3c0   : > { %v1194_v34 = vpop.permute.xlu1 %1193  ;;  %v1209_v46 = vmax.f32 %v1185_v41, %v1192_v33 }
 0x3c1   : > { %v1210_v48 = vmax.f32 %v1186_v44, %v1194_v34 }
 0x3c3   : > { %v1196_v35 = vpop.permute.xlu0 %1195 }
 0x3c4   : > { %v1198_v37 = vpop.permute.xlu1 %1197  ;;  %v1211_v61 = vmax.f32 %v1187_v50, %v1196_v35 }
 0x3c5   : > { %v1212_v12 = vmax.f32 %v1188_v55, %v1198_v37 }
 0x3c7   : > { %v1200_v40 = vpop.permute.xlu0 %1199 }
 0x3c8   : > { %v1202_v43 = vpop.permute.xlu1 %1201  ;;  %v1213_v21 = vmax.f32 %v1189_v14, %v1200_v40 }
 0x3c9   : > { %v1214_v22 = vmax.f32 %v1190_v17, %v1202_v43 }
 0x3cb   : > { %v1216_v49 = vpop.permute.xlu0 %1215 }
 0x3cc   : > { %v1233_v52 = vmax.f32 %v1209_v46, %v1216_v49  ;;  %v1218_v53 = vpop.permute.xlu1 %1217 }
 0x3cd   : > { %v1234_v56 = vmax.f32 %v1210_v48, %v1218_v53 }
 0x3ce   : > { %1239 = vst.msk [vmem:[#allocation3] sm:$0xff] %vm770_vm9, %v1233_v52 }
 0x3cf   : > { %1240 = vst.msk [vmem:[#allocation3 + $0x8] sm:$0xff] %vm770_vm9, %v1234_v56  ;;  %v1220_v13 = vpop.permute.xlu0 %1219 }
 0x3d0   : > { %v1235_v15 = vmax.f32 %v1211_v61, %v1220_v13  ;;  %v1222_v16 = vpop.permute.xlu1 %1221 }
 0x3d1   : > { %v1236_v18 = vmax.f32 %v1212_v12, %v1222_v16 }
 0x3d2   : > { %1241 = vst.msk [vmem:[#allocation3 + $0x10] sm:$0xf] %vm773_vm10, %v1235_v15 }
 0x3d3   : > { %1242 = vst.msk [vmem:[#allocation3 + $0x18] sm:$0xff] %vm770_vm9, %v1236_v18  ;;  %v1224_v19 = vpop.permute.xlu0 %1223 }
 0x3d4   : > { %v1237_v23 = vmax.f32 %v1213_v21, %v1224_v19  ;;  %v1226_v24 = vpop.permute.xlu1 %1225 }
 0x3d5   : > { %v1238_v25 = vmax.f32 %v1214_v22, %v1226_v24  ;;  %v1245_v20 = vld [vmem:[#allocation3] sm:$0xff] }
 0x3d6   : > { %1243 = vst.msk [vmem:[#allocation3 + $0x20] sm:$0xff] %vm770_vm9, %v1237_v23  ;;  %v1249_v26 = vld [vmem:[#allocation3 + $0x1] sm:$0xff] }
 0x3d7   : > { %1244 = vst.msk [vmem:[#allocation3 + $0x28] sm:$0xf] %vm773_vm10, %v1238_v25  ;;  %v1253_v27 = vmax.f32 %v1245_v20, %v1249_v26  ;;  %v1257_v28 = vld [vmem:[#allocation3 + $0x2] sm:$0xff] }
 0x3d8   : > { %v1246_v30 = vld [vmem:[#allocation3 + $0x8] sm:$0xff] }
 0x3d9   : > { %v1261_v29 = vmax.f32 %v1253_v27, %v1257_v28  ;;  %v1250_v31 = vld [vmem:[#allocation3 + $0x9] sm:$0xff] }
 0x3da   : > { %v1265_v32 = vld [vmem:[#allocation3 + $0x3] sm:$0xff]  ;;  %v1254_v33 = vmax.f32 %v1246_v30, %v1250_v31  ;;  %v1266_v40 = vld [vmem:[#allocation3 + $0xb] sm:$0xff]  ;;  %v1247_v41 = vld [vmem:[#allocation3 + $0x18] sm:$0xff] }
 0x3db   : > { %v1269_v34 = vmax.f32 %v1261_v29, %v1265_v32  ;;  %v1258_v35 = vld [vmem:[#allocation3 + $0xa] sm:$0xff] }
 0x3dc   : > { %v1273_v37 = vld [vmem:[#allocation3 + $0x4] sm:$0xff]  ;;  %v1262_v38 = vmax.f32 %v1254_v33, %v1258_v35  ;;  %v1274_v48 = vld [vmem:[#allocation3 + $0xc] sm:$0xff] }
 0x3dd   : > { %v1277_v39 = vmax.f32 %v1269_v34, %v1273_v37  ;;  %v1251_v43 = vld [vmem:[#allocation3 + $0x19] sm:$0xff] }
 0x3de   : > { %v1270_v44 = vmax.f32 %v1262_v38, %v1266_v40  ;;  %v1255_v45 = vmax.f32 %v1247_v41, %v1251_v43  ;;  %v1248_v46 = vld [vmem:[#allocation3 + $0x20] sm:$0xff] }
 0x3df   : > { %v1252_v47 = vld [vmem:[#allocation3 + $0x21] sm:$0xff]  ;;  %1576 = vrot.lane.b32.xlu0 %v1277_v39, %s2322_s17  ;;  %v1284_v14 = vcombine.high %v1277_v39, %v2310_v0  ;;  %v2617_v21 = vrot.slane %v1277_v39, %v2467_v42 }
 0x3e0   : > { %v1259_v49 = vld [vmem:[#allocation3 + $0x1a] sm:$0xff]  ;;  %v1256_v50 = vmax.f32 %v1248_v46, %v1252_v47  ;;  %v1278_v52 = vmax.f32 %v1270_v44, %v1274_v48  ;;  %v1260_v55 = vld [vmem:[#allocation3 + $0x22] sm:$0xff] }
 0x3e1   : > { %v1263_v53 = vmax.f32 %v1255_v45, %v1259_v49  ;;  %v1267_v56 = vld [vmem:[#allocation3 + $0x1b] sm:$0xff]  ;;  %v1268_v11 = vld [vmem:[#allocation3 + $0x23] sm:$0xff]  ;;  %v2633_v20 = vrot.slane %v1284_v14, %v2467_v42  ;;  %v2724_v49 = vrot.slane %v847_v1, %v2474_v54  ;;  %v862_v1 = vrot.slane %v848_v2, %v2474_v54 }
 0x3e2   : > { %v1264_v58 = vmax.f32 %v1256_v50, %v1260_v55  ;;  %1578 = vrot.lane.b32.xlu1 %v1278_v52, %s2322_s17  ;;  %v1275_v12 = vld [vmem:[#allocation3 + $0x1c] sm:$0xff]  ;;  %v1276_v16 = vld [vmem:[#allocation3 + $0x24] sm:$0xff]  ;;  %v1350_v17 = vcombine.high %v1278_v52, %v2310_v0  ;;  %v2625_v23 = vrot.slane %v1278_v52, %v2467_v42  ;;  %v2730_v50 = vrot.slane %v913_v5, %v2474_v54 }
 0x3e3   : > { %v1271_v61 = vmax.f32 %v1263_v53, %v1267_v56  ;;  %v879_v52 = vcombine.high %v2724_v49, %v2310_v0  ;;  %v928_v5 = vrot.slane %v914_v6, %v2474_v54  ;;  %v880_v59 = vcombine.high %v862_v1, %v2310_v0 }
 0x3e4   : > { %v1272_v13 = vmax.f32 %v1264_v58, %v1268_v11  ;;  %v2643_v29 = vrot.slane %v1350_v17, %v2467_v42  ;;  %v945_v53 = vcombine.high %v2730_v50, %v2310_v0  ;;  %v947_v6 = vcombine.high %v937_v51, %v2310_v0 }
 0x3e5   : > { %v1279_v15 = vmax.f32 %v1271_v61, %v1275_v12  ;;  %v946_v58 = vcombine.high %v928_v5, %v2310_v0  ;;  %v881_v12 = vcombine.high %v871_v9, %v2310_v0 }
 0x3e6   : > { %v1280_v18 = vmax.f32 %v1272_v13, %v1276_v16 }
 0x3e7   : > { %1580 = vrot.lane.b32.xlu0 %v1279_v15, %s2322_s17  ;;  %v1299_v22 = vcombine.high %v1279_v15, %v2310_v0  ;;  %v2622_v19 = vrot.slane %v1279_v15, %v2467_v42 }
 0x3e8   : > { %1582 = vrot.lane.b32.xlu1 %v1280_v18, %s2322_s17  ;;  %v1365_v24 = vcombine.high %v1280_v18, %v2310_v0  ;;  %v2630_v25 = vrot.slane %v1280_v18, %v2467_v42 }
 0x3e9   : > { %v2636_v26 = vrot.slane %v1299_v22, %v2467_v42  ;;  %v1314_v27 = vcombine.low %v2617_v21, %v2622_v19  ;;  %v1315_v28 = vcombine.high %v2617_v21, %v2622_v19 }
 0x3ea   : > { %v2646_v30 = vrot.slane %v1365_v24, %v2467_v42  ;;  %v1380_v31 = vcombine.low %v2625_v23, %v2630_v25  ;;  %v1381_v32 = vcombine.high %v2625_v23, %v2630_v25 }
 0x3eb   : > { %v1330_v33 = vcombine.low %v2633_v20, %v2636_v26  ;;  %v1331_v34 = vcombine.high %v2633_v20, %v2636_v26  ;;  %v2769_v60 = vrot.slane %v1314_v27, %v2474_v54  ;;  %v1329_v11 = vrot.slane %v1315_v28, %v2474_v54 }
 0x3ec   : > { %v1396_v35 = vcombine.low %v2643_v29, %v2646_v30  ;;  %v1397_v37 = vcombine.high %v2643_v29, %v2646_v30  ;;  %v2751_v55 = vrot.slane %v1380_v31, %v2474_v54  ;;  %v1395_v62 = vrot.slane %v1381_v32, %v2474_v54 }
 0x3ed   : > { %v1346_v2 = vcombine.high %v2769_v60, %v2310_v0  ;;  %v1347_v13 = vcombine.high %v1329_v11, %v2310_v0  ;;  %v1338_v10 = vrot.slane %v1330_v33, %v2474_v54  ;;  %v1345_v17 = vrot.slane %v1331_v34, %v2474_v54 }
 0x3ee   : > { %v1412_v56 = vcombine.high %v2751_v55, %v2310_v0  ;;  %v1413_v61 = vcombine.high %v1395_v62, %v2310_v0  ;;  %v1404_v14 = vrot.slane %v1396_v35, %v2474_v54  ;;  %v1411_v16 = vrot.slane %v1397_v37, %v2474_v54 }
 0x3ef   : > { %v1348_v8 = vcombine.high %v1338_v10, %v2310_v0  ;;  %v1349_v21 = vcombine.high %v1345_v17, %v2310_v0 }
 0x3f0   : > { %v1414_v15 = vcombine.high %v1404_v14, %v2310_v0  ;;  %v1415_v18 = vcombine.high %v1411_v16, %v2310_v0 }
 0x451   : > { %v1577_v38 = vpop.permute.xlu0 %1576 }
 0x452   : > { %1588 = vst.msk [vmem:[#allocation2 + $0x2] sm:$0xff] %vm657_vm8, %v1577_v38 }
 0x454   : > { %v1579_v39 = vpop.permute.xlu1 %1578 }
 0x455   : > { %1589 = vst.msk [vmem:[#allocation2 + $0xa] sm:$0xff] %vm657_vm8, %v1579_v39 }
 0x459   : > { %v1581_v40 = vpop.permute.xlu0 %1580  ;;  %v2682_v48 = vld [vmem:[#allocation2] sm:$0xff] }
 0x45a   : > { %1590 = vst.msk [vmem:[#allocation2 + $0x1a] sm:$0xff] %vm657_vm8, %v1581_v40  ;;  %v1583_v41 = vpop.permute.xlu1 %1582 }
 0x45b   : > { %1591 = vst.msk [vmem:[#allocation2 + $0x22] sm:$0xff] %vm657_vm8, %v1583_v41 }
 0x45c   : > { %v2664_v43 = vld [vmem:[#allocation2 + $0x10] sm:$0xf]  ;;  %v2666_v44 = vld [vmem:[#allocation2 + $0x8] sm:$0xff] }
 0x45d   : > { %1608 = vrot.lane.b32.xlu1 %v2664_v43, %s2323_s18  ;;  %1606 = vrot.lane.b32.xlu0 %v2666_v44, %s2323_s18 }
 0x461   : > { %v2680_v47 = vld [vmem:[#allocation2 + $0x18] sm:$0xff] }
 0x462   : > { %v2672_v45 = vld [vmem:[#allocation2 + $0x28] sm:$0xf]  ;;  %v2674_v46 = vld [vmem:[#allocation2 + $0x20] sm:$0xff] }
 0x463   : > { %1614 = vrot.lane.b32.xlu1 %v2672_v45, %s2323_s18  ;;  %1612 = vrot.lane.b32.xlu0 %v2674_v46, %s2323_s18 }
 0x467   : > { %1610 = vrot.lane.b32.xlu1 %v2680_v47, %s2323_s18  ;;  %1604 = vrot.lane.b32.xlu0 %v2682_v48, %s2323_s18 }
 0x46b   : > { %1632 = vrot.lane.b32.xlu1 %v2664_v43, %s2324_s19  ;;  %1630 = vrot.lane.b32.xlu0 %v2666_v44, %s2324_s19 }
 0x46f   : > { %1638 = vrot.lane.b32.xlu1 %v2672_v45, %s2324_s19  ;;  %1636 = vrot.lane.b32.xlu0 %v2674_v46, %s2324_s19 }
 0x473   : > { %1634 = vrot.lane.b32.xlu1 %v2680_v47, %s2324_s19  ;;  %1628 = vrot.lane.b32.xlu0 %v2682_v48, %s2324_s19 }
 0x477   : > { %1656 = vrot.lane.b32.xlu1 %v2664_v43, %s2325_s20  ;;  %1654 = vrot.lane.b32.xlu0 %v2666_v44, %s2325_s20 }
 0x47b   : > { %1662 = vrot.lane.b32.xlu1 %v2672_v45, %s2325_s20  ;;  %1660 = vrot.lane.b32.xlu0 %v2674_v46, %s2325_s20 }
 0x47f   : > { %1658 = vrot.lane.b32.xlu1 %v2680_v47, %s2325_s20  ;;  %1652 = vrot.lane.b32.xlu0 %v2682_v48, %s2325_s20  ;;  %s269_s20 = sand.u32 1, %s2300_s25  }
 0x483   : > { %1680 = vrot.lane.b32.xlu1 %v2664_v43, %s2326_s21  ;;  %1678 = vrot.lane.b32.xlu0 %v2666_v44, %s2326_s21 }
 0x487   : > { %1686 = vrot.lane.b32.xlu1 %v2672_v45, %s2326_s21  ;;  %1684 = vrot.lane.b32.xlu0 %v2674_v46, %s2326_s21 }
 0x48b   : > { %1682 = vrot.lane.b32.xlu1 %v2680_v47, %s2326_s21  ;;  %1676 = vrot.lane.b32.xlu0 %v2682_v48, %s2326_s21  ;;  %s2148_s21 = sshll.u32 %s269_s20, 3 }
 0x48c   : > { %s271_s23 = scalar_lea.vmem [#allocation5], %s2148_s21 }
 0x48f   : > { %950 = vrot.lane.b32.xlu1 %v879_v52, %s2316_s14  ;;  %978 = vrot.lane.b32.xlu0 %v945_v53, %s2316_s14 }
 0x493   : > { %954 = vrot.lane.b32.xlu1 %v862_v1, %s2318_s16  ;;  %982 = vrot.lane.b32.xlu0 %v928_v5, %s2318_s16 }
 0x497   : > { %1445 = vrot.lane.b32.xlu1 %v1412_v56, %s2316_s14  ;;  %986 = vrot.lane.b32.xlu0 %v946_v58, %s2314_s9 }
 0x49b   : > { %990 = vrot.lane.b32.xlu1 %v937_v51, %s2317_s15  ;;  %958 = vrot.lane.b32.xlu0 %v880_v59, %s2314_s9 }
 0x49f   : > { %1449 = vrot.lane.b32.xlu1 %v1395_v62, %s2318_s16  ;;  %1417 = vrot.lane.b32.xlu0 %v1346_v2, %s2316_s14 }
 0x4a3   : > { %994 = vrot.lane.b32.xlu1 %v947_v6, %s2312_s29  ;;  %962 = vrot.lane.b32.xlu0 %v871_v9, %s2317_s15 }
 0x4a7   : > { %1453 = vrot.lane.b32.xlu1 %v1413_v61, %s2314_s9  ;;  %1421 = vrot.lane.b32.xlu0 %v1329_v11, %s2318_s16 }
 0x4ab   : > { %966 = vrot.lane.b32.xlu1 %v881_v12, %s2312_s29  ;;  %998 = vrot.lane.b32.xlu0 %v944_v7, %s2315_s13 }
 0x4af   : > { %1425 = vrot.lane.b32.xlu1 %v1347_v13, %s2314_s9  ;;  %1457 = vrot.lane.b32.xlu0 %v1404_v14, %s2317_s15 }
 0x4b3   : > { %970 = vrot.lane.b32.xlu1 %v878_v3, %s2315_s13  ;;  %1002 = vrot.lane.b32.xlu0 %v948_v4, %s2313_s8 }
 0x4b7   : > { %1429 = vrot.lane.b32.xlu1 %v1338_v10, %s2317_s15  ;;  %1461 = vrot.lane.b32.xlu0 %v1414_v15, %s2312_s29 }
 0x4bb   : > { %974 = vrot.lane.b32.xlu1 %v882_v63, %s2313_s8  ;;  %1433 = vrot.lane.b32.xlu0 %v1348_v8, %s2312_s29 }
 0x4bf   : > { %1465 = vrot.lane.b32.xlu1 %v1411_v16, %s2315_s13  ;;  %1437 = vrot.lane.b32.xlu0 %v1345_v17, %s2315_s13 }
 0x4c3   : > { %1469 = vrot.lane.b32.xlu1 %v1415_v18, %s2313_s8  ;;  %1441 = vrot.lane.b32.xlu0 %v1349_v21, %s2313_s8 }
 0x4cf   : > { %v1607_v22 = vpop.permute.xlu0 %1606  ;;  %v1609_v19 = vpop.permute.xlu1 %1608 }
 0x4d0   : > { %v1623_v37 = vmax.f32 %v2666_v44, %v1607_v22  ;;  %v1624_v38 = vmax.f32 %v2664_v43, %v1609_v19 }
 0x4d5   : > { %v1613_v23 = vpop.permute.xlu0 %1612  ;;  %v1615_v24 = vpop.permute.xlu1 %1614 }
 0x4d6   : > { %v1626_v53 = vmax.f32 %v2674_v46, %v1613_v23  ;;  %v1627_v1 = vmax.f32 %v2672_v45, %v1615_v24 }
 0x4d9   : > { %v1605_v25 = vpop.permute.xlu0 %1604  ;;  %v1611_v27 = vpop.permute.xlu1 %1610 }
 0x4da   : > { %v1622_v44 = vmax.f32 %v2682_v48, %v1605_v25  ;;  %v1625_v43 = vmax.f32 %v2680_v47, %v1611_v27 }
 0x4dd   : > { %v1631_v20 = vpop.permute.xlu0 %1630  ;;  %v1633_v26 = vpop.permute.xlu1 %1632 }
 0x4de   : > { %v1647_v41 = vmax.f32 %v1623_v37, %v1631_v20  ;;  %v1648_v52 = vmax.f32 %v1624_v38, %v1633_v26 }
 0x4e1   : > { %v1637_v28 = vpop.permute.xlu0 %1636  ;;  %v1639_v29 = vpop.permute.xlu1 %1638 }
 0x4e2   : > { %v1650_v59 = vmax.f32 %v1626_v53, %v1637_v28  ;;  %v1651_v62 = vmax.f32 %v1627_v1, %v1639_v29 }
 0x4e5   : > { %v1629_v30 = vpop.permute.xlu0 %1628  ;;  %v1635_v31 = vpop.permute.xlu1 %1634 }
 0x4e6   : > { %v1646_v11 = vmax.f32 %v1622_v44, %v1629_v30  ;;  %v1649_v12 = vmax.f32 %v1625_v43, %v1635_v31 }
 0x4e9   : > { %v1655_v32 = vpop.permute.xlu0 %1654  ;;  %v1657_v33 = vpop.permute.xlu1 %1656 }
 0x4ea   : > { %v1671_v5 = vmax.f32 %v1647_v41, %v1655_v32  ;;  %v1672_v56 = vmax.f32 %v1648_v52, %v1657_v33 }
 0x4ed   : > { %v1661_v34 = vpop.permute.xlu0 %1660  ;;  %v1663_v35 = vpop.permute.xlu1 %1662 }
 0x4ee   : > { %v1674_v9 = vmax.f32 %v1650_v59, %v1661_v34  ;;  %v1675_v61 = vmax.f32 %v1651_v62, %v1663_v35 }
 0x4f1   : > { %v1653_v39 = vpop.permute.xlu0 %1652  ;;  %v1659_v40 = vpop.permute.xlu1 %1658 }
 0x4f2   : > { %v1670_v14 = vmax.f32 %v1646_v11, %v1653_v39  ;;  %v1673_v3 = vmax.f32 %v1649_v12, %v1659_v40 }
 0x4f5   : > { %v1679_v58 = vpop.permute.xlu0 %1678  ;;  %v1681_v51 = vpop.permute.xlu1 %1680 }
 0x4f6   : > { %v1695_v2 = vmax.f32 %v1671_v5, %v1679_v58  ;;  %v1696_v6 = vmax.f32 %v1672_v56, %v1681_v51 }
 0x4f8   : > { %1701 = vst.msk [vmem:[#allocation3 + $0x8] sm:$0xff] %vm770_vm9, %v1695_v2 }
 0x4f9   : > { %1702 = vst.msk [vmem:[#allocation3 + $0x10] sm:$0xf] %vm773_vm10, %v1696_v6  ;;  %v1685_v46 = vpop.permute.xlu0 %1684  ;;  %v1687_v45 = vpop.permute.xlu1 %1686 }
 0x4fa   : > { %v1698_v7 = vmax.f32 %v1674_v9, %v1685_v46  ;;  %v1699_v13 = vmax.f32 %v1675_v61, %v1687_v45 }
 0x4fc   : > { %1704 = vst.msk [vmem:[#allocation3 + $0x20] sm:$0xff] %vm770_vm9, %v1698_v7 }
 0x4fd   : > { %1705 = vst.msk [vmem:[#allocation3 + $0x28] sm:$0xf] %vm773_vm10, %v1699_v13  ;;  %v1677_v48 = vpop.permute.xlu0 %1676  ;;  %v1683_v47 = vpop.permute.xlu1 %1682 }
 0x4fe   : > { %v1694_v4 = vmax.f32 %v1670_v14, %v1677_v48  ;;  %v1697_v10 = vmax.f32 %v1673_v3, %v1683_v47 }
 0x4ff   : > { %v1707_v15 = vld [vmem:[#allocation3 + $0x8] sm:$0xff] }
 0x500   : > { %v1711_v57 = vld [vmem:[#allocation3 + $0x9] sm:$0xff]  ;;  %1700 = vst.msk [vmem:[#allocation3] sm:$0xff] %vm770_vm9, %v1694_v4  ;;  %1703 = vst.msk [vmem:[#allocation3 + $0x18] sm:$0xff] %vm770_vm9, %v1697_v10 }
 0x501   : > { %v1715_v63 = vmax.f32 %v1707_v15, %v1711_v57  ;;  %v2858_v8 = vpop.permute.xlu0 %978  ;;  %v2860_v16 = vpop.permute.xlu1 %950  ;;  %v1719_v17 = vld [vmem:[#allocation3 + $0xa] sm:$0xff] }
 0x502   : > { %v1727_v19 = vld [vmem:[#allocation3 + $0xb] sm:$0xff] }
 0x503   : > { %v1723_v18 = vmax.f32 %v1715_v63, %v1719_v17  ;;  %v1709_v21 = vld [vmem:[#allocation3 + $0x20] sm:$0xff]  ;;  %v1735_v29 = vld [vmem:[#allocation3 + $0xc] sm:$0xff] }
 0x504   : > { %v1713_v22 = vld [vmem:[#allocation3 + $0x21] sm:$0xff] }
 0x505   : > { %v1717_v23 = vmax.f32 %v1709_v21, %v1713_v22  ;;  %v1731_v24 = vmax.f32 %v1723_v18, %v1727_v19  ;;  %v2862_v25 = vpop.permute.xlu0 %982  ;;  %v2864_v27 = vpop.permute.xlu1 %954  ;;  %v1721_v20 = vld [vmem:[#allocation3 + $0x22] sm:$0xff] }
 0x506   : > { %v1729_v28 = vld [vmem:[#allocation3 + $0x23] sm:$0xff] }
 0x507   : > { %v1725_v26 = vmax.f32 %v1717_v23, %v1721_v20  ;;  %v1706_v30 = vld [vmem:[#allocation3] sm:$0xff]  ;;  %v1708_v31 = vld [vmem:[#allocation3 + $0x18] sm:$0xff]  ;;  %v1739_v34 = vmax.f32 %v1731_v24, %v1735_v29 }
 0x508   : > { %v1710_v32 = vld [vmem:[#allocation3 + $0x1] sm:$0xff]  ;;  %v1712_v35 = vld [vmem:[#allocation3 + $0x19] sm:$0xff] }
 0x509   : > { %v1733_v33 = vmax.f32 %v1725_v26, %v1729_v28  ;;  %v1714_v37 = vmax.f32 %v1706_v30, %v1710_v32  ;;  %v2866_v38 = vpop.permute.xlu0 %986  ;;  %v2868_v39 = vpop.permute.xlu1 %1445  ;;  %v1737_v40 = vld [vmem:[#allocation3 + $0x24] sm:$0xff]  ;;  %v1716_v41 = vmax.f32 %v1708_v31, %v1712_v35  ;;  %v1720_v1 = vld [vmem:[#allocation3 + $0x1a] sm:$0xff]  ;;  %v1818_v51 = vrot.slane %v1739_v34, %v2467_v42 }
 0x50a   : > { %v1718_v52 = vld [vmem:[#allocation3 + $0x2] sm:$0xff]  ;;  %v1811_v57 = vcombine.high %v1739_v34, %v2310_v0 }
 0x50b   : > { %v1741_v53 = vmax.f32 %v1733_v33, %v1737_v40  ;;  %v1722_v5 = vmax.f32 %v1714_v37, %v1718_v52  ;;  %v1724_v56 = vmax.f32 %v1716_v41, %v1720_v1  ;;  %v1726_v58 = vld [vmem:[#allocation3 + $0x3] sm:$0xff]  ;;  %v1728_v62 = vld [vmem:[#allocation3 + $0x1b] sm:$0xff]  ;;  %v1018_v52 = vsel %vm770_vm9, %v2730_v50, %v2858_v8 }
 0x50c   : > { %v1734_v46 = vld [vmem:[#allocation3 + $0x4] sm:$0xff]  ;;  %v1736_v45 = vld [vmem:[#allocation3 + $0x1c] sm:$0xff]  ;;  %v1825_v20 = vrot.slane %v1811_v57, %v2467_v42 }
 0x50d   : > { %v1833_v59 = vrot.slane %v1741_v53, %v2467_v42  ;;  %v1730_v2 = vmax.f32 %v1722_v5, %v1726_v58  ;;  %v2872_v6 = vpop.permute.xlu0 %958  ;;  %v991_v44 = vpop.permute.xlu1 %990  ;;  %v1732_v43 = vmax.f32 %v1724_v56, %v1728_v62  ;;  %v1826_v4 = vcombine.high %v1741_v53, %v2310_v0 }
 0x50e   : > { %v1019_v5 = vsel %vm1006_vm11, %v1018_v52, %v2862_v25 }
 0x50f   : > { %v1842_v9 = vcombine.high %v1818_v51, %v1833_v59  ;;  %v1841_v61 = vcombine.low %v1818_v51, %v1833_v59  ;;  %v1738_v11 = vmax.f32 %v1730_v2, %v1734_v46  ;;  %v1740_v12 = vmax.f32 %v1732_v43, %v1736_v45 }
 0x510   : > { %v1840_v24 = vrot.slane %v1826_v4, %v2467_v42  ;;  %v1020_v59 = vsel %vm1008_vm12, %v1019_v5, %v2866_v38 }
 0x511   : > { %v1856_v7 = vrot.slane %v1842_v9, %v2474_v54  ;;  %v2876_v13 = vrot.slane %v1841_v61, %v2474_v54  ;;  %v2878_v14 = vpop.permute.xlu0 %1417  ;;  %v2880_v3 = vpop.permute.xlu1 %1449  ;;  %v1752_v48 = vrot.slane %v1738_v11, %v2467_v42  ;;  %v1767_v47 = vrot.slane %v1740_v12, %v2467_v42 }
 0x512   : > { %v1745_v17 = vcombine.high %v1738_v11, %v2310_v0  ;;  %v1760_v18 = vcombine.high %v1740_v12, %v2310_v0  ;;  %v1857_v33 = vcombine.low %v1825_v20, %v1840_v24  ;;  %v1858_v1 = vcombine.high %v1825_v20, %v1840_v24 }
 0x513   : > { %1910 = vrot.lane.b32.xlu0 %v1856_v7, %s2318_s16  ;;  %v1776_v10 = vcombine.high %v1752_v48, %v1767_v47  ;;  %v1775_v15 = vcombine.low %v1752_v48, %v1767_v47  ;;  %v1873_v63 = vcombine.high %v2876_v13, %v2310_v0  ;;  %v1874_v26 = vcombine.high %v1856_v7, %v2310_v0 }
 0x514   : > { %v1759_v28 = vrot.slane %v1745_v17, %v2467_v42  ;;  %v1774_v29 = vrot.slane %v1760_v18, %v2467_v42  ;;  %v1865_v41 = vrot.slane %v1857_v33, %v2474_v54  ;;  %v1021_v50 = vsel %vm1010_vm13, %v1020_v59, %v991_v44 }
 0x515   : > { %v963_v21 = vpop.permute.xlu0 %962  ;;  %v995_v22 = vpop.permute.xlu1 %994  ;;  %v1790_v19 = vrot.slane %v1776_v10, %v2474_v54  ;;  %v2893_v23 = vrot.slane %v1775_v15, %v2474_v54  ;;  %v1872_v25 = vrot.slane %v1858_v1, %v2474_v54  ;;  %v1005_v44 = vsel %vm770_vm9, %v2724_v49, %v2860_v16  ;;  %v2034_v49 = vld [vmem:[%s3052_s5] sm:$0xf] }
 0x516   : > { %v1791_v35 = vcombine.low %v1759_v28, %v1774_v29  ;;  %v1792_v42 = vcombine.high %v1759_v28, %v1774_v29  ;;  %v1022_v8 = vsel %vm1012_vm14, %v1021_v50, %v995_v22  ;;  %v1875_v9 = vcombine.high %v1865_v41, %v2310_v0 }
 0x517   : > { %1906 = vrot.lane.b32.xlu0 %v1873_v63, %s2316_s14  ;;  %1882 = vrot.lane.b32.xlu1 %v1790_v19, %s2318_s16  ;;  %v1807_v32 = vcombine.high %v2893_v23, %v2310_v0  ;;  %v1808_v34 = vcombine.high %v1790_v19, %v2310_v0  ;;  %v1007_v61 = vsel %vm1006_vm11, %v1005_v44, %v2864_v27  ;;  %v2048_v63 = vld [vmem:[%s3053_s6] sm:$0xf]  ;;  %v2165_v44 = vld [vmem:[%s3051_s4 + $0xc] sm:$0xf] }
 0x518   : > { %v1799_v53 = vrot.slane %v1791_v35, %v2474_v54  ;;  %v1806_v51 = vrot.slane %v1792_v42, %v2474_v54  ;;  %v1876_v54 = vcombine.high %v1872_v25, %v2310_v0  ;;  %v1009_v12 = vsel %vm1008_vm12, %v1007_v61, %v2872_v6  ;;  %v2157_v6 = vld [vmem:[%s3051_s4 + $0x4] sm:$0xf]  ;;  %v469_v61 = vpop.f32.mrf.mxu1 }
 0x519   : > { %v2902_v30 = vpop.permute.xlu0 %1421  ;;  %v2904_v31 = vpop.permute.xlu1 %1453  ;;  %v1011_v7 = vsel %vm1010_vm13, %v1009_v12, %v963_v21  ;;  %v1479_v15 = vsel %vm770_vm9, %v2751_v55, %v2868_v39  ;;  %v1472_v57 = vsel %vm770_vm9, %v2769_v60, %v2878_v14 }
 0x51a   : > { %v1809_v11 = vcombine.high %v1799_v53, %v2310_v0  ;;  %v1810_v4 = vcombine.high %v1806_v51, %v2310_v0  ;;  %v1480_v17 = vsel %vm1006_vm11, %v1479_v15, %v2880_v3  ;;  %v1473_v18 = vsel %vm1006_vm11, %v1472_v57, %v2902_v30  ;;  %v2161_v30 = vld [vmem:[%s3051_s4 + $0x8] sm:$0xf] }
 0x51b   : > { %1914 = vrot.lane.b32.xlu0 %v1874_v26, %s2314_s9  ;;  %1878 = vrot.lane.b32.xlu1 %v1807_v32, %s2316_s14  ;;  %v1481_v55 = vsel %vm1008_vm12, %v1480_v17, %v2904_v31 }
 0x51d   : > { %v999_v37 = vpop.permute.xlu0 %998  ;;  %v967_v40 = vpop.permute.xlu1 %966 }
 0x51e   : > { %v1023_v62 = vsel %vm1014_vm15, %v1022_v8, %v999_v37  ;;  %v1013_v16 = vsel %vm1012_vm14, %v1011_v7, %v967_v40  ;;  %v2327_v7 = vmov 839922192  }
 0x51f   : > { %1886 = vrot.lane.b32.xlu0 %v1808_v34, %s2314_s9  ;;  %1918 = vrot.lane.b32.xlu1 %v1865_v41, %s2317_s15  ;;  %s2085_s9 = sshll.u32 %s271_s23, 4  ;;  %s2086_s9 = int_to_ptr.vmem [resolvable:$true] %s2085_s9 }
 0x520   : > { %s2248_s16 = scalar_lea.vmem %s2086_s9, 128 }
 0x521   : > { %v1458_v56 = vpop.permute.xlu0 %1457  ;;  %v1426_v58 = vpop.permute.xlu1 %1425  ;;  %p2249_p11 = scmp.ne.s32.totalorder %s2086_s9, %s2248_s16 }
 0x522   : > { %v1474_v60 = vsel %vm1008_vm12, %v1473_v18, %v1426_v58  ;;  %v1482_v39 = vsel %vm1010_vm13, %v1481_v55, %v1458_v56 }
 0x523   : > { %1890 = vrot.lane.b32.xlu0 %v1799_v53, %s2317_s15  ;;  %1898 = vrot.lane.b32.xlu1 %v1806_v51, %s2315_s13  ;;  %s2083_s15 = scalar_lea.hbm %s3054_s7, %s2175_s22  ;;  %p2250_p12 = pnand %p2249_p11, %p2407_p5 }
 0x525   : > { %v1003_v2 = vpop.permute.xlu0 %1002  ;;  %v971_v43 = vpop.permute.xlu1 %970  ;;  %p2251_p13 = pneg %p2250_p12 }
 0x526   : > { %v1024_v38 = vsel %vm1016_vm0, %v1023_v62, %v1003_v2  ;;  %v1015_v27 = vsel %vm1014_vm15, %v1013_v16, %v971_v43 }
 0x527   : > { %1926 = vrot.lane.b32.xlu0 %v1872_v25, %s2315_s13  ;;  %1922 = vrot.lane.b32.xlu1 %v1875_v9, %s2312_s29 }
 0x528   : > { %2158 = vmatprep.subr.msk.mxu0 %vm396_vm2, %v1024_v38 }
 0x529   : > { %v1462_v46 = vpop.permute.xlu0 %1461  ;;  %v1430_v45 = vpop.permute.xlu1 %1429 }
 0x52a   : > { %v1475_v14 = vsel %vm1010_vm13, %v1474_v60, %v1430_v45  ;;  %v1483_v19 = vsel %vm1012_vm14, %v1482_v39, %v1462_v46  ;;  %v471_v46 = vpop.f32.mrf.mxu1 }
 0x52b   : > { %1930 = vrot.lane.b32.xlu0 %v1876_v54, %s2313_s8  ;;  %1894 = vrot.lane.b32.xlu1 %v1809_v11, %s2312_s29  ;;  %v476_v16 = vcombine.low %v469_v61, %v471_v46  ;;  %s2071_s29 = scalar_lea.sflag [#allocation6], %s269_s20 }
 0x52d   : > { %v1434_v48 = vpop.permute.xlu0 %1433  ;;  %v975_v47 = vpop.permute.xlu1 %974 }
 0x52e   : > { %v1017_v10 = vsel %vm1016_vm0, %v1015_v27, %v975_v47  ;;  %v1476_v3 = vsel %vm1012_vm14, %v1475_v14, %v1434_v48 }
 0x52f   : > { %2037 = vperm.xlu0 %2233, %v2034_v49   ;;  %1902 = vrot.lane.b32.xlu1 %v1810_v4, %s2313_s8  ;;  %v2040_v49 = vunpack.c.l.s4 %v2327_v7  ;;  %s2328_s8 = smov [#allocation5]  }
 0x530   : > { %2159 = vmatpush1.msk.msra.mxu0 %vm396_vm2, %v1017_v10  ;;  %s2252_s17 = sshll.u32 %s2328_s8, 4  ;;  %s2253_s17 = int_to_ptr.vmem [resolvable:$false] %s2252_s17 }
 0x531   : > { %2160 = vmatmul.mubr.msk.f32.vlgmr.msra.gmra.mxu0 %vm392_vm3, %v2157_v6  ;;  %v1438_v21 = vpop.permute.xlu0 %1437  ;;  %v1466_v22 = vpop.permute.xlu1 %1465  ;;  %v2041_v47 = vunpack.c.0.s8 %v2040_v49  ;;  %s2254_s28 = scalar_lea.vmem %s2253_s17, 256  ;;  %p2255_p0 = scmp.lt.s32.totalorder %s2086_s9, %s2253_s17 }
 0x532   : > { %2020 = vmatprep.mubr.f32.mxu0 %v2310_v0  ;;  %v1477_v24 = vsel %vm1014_vm15, %v1476_v3, %v1438_v21  ;;  %v1484_v20 = vsel %vm1014_vm15, %v1483_v19, %v1466_v22  ;;  %p2256_p1 = scmp.lt.s32.totalorder %s2254_s28, %s2248_s16 }
 0x533   : > { %2051 = vperm.xlu1 %2234, %v2048_v63   ;;  %v2044_v15 = vsub.s32 %v2041_v47, %v2464_v36 }
 0x534   : > { %p2257_p2 = por %p2256_p1, %p2255_p0 }
 0x535   : > { %v1442_v26 = vpop.permute.xlu0 %1441  ;;  %v1470_v0 = vpop.permute.xlu1 %1469 }
 0x536   : > { %v1478_v28 = vsel %vm1016_vm0, %v1477_v24, %v1442_v26  ;;  %v1485_v29 = vsel %vm1016_vm0, %v1484_v20, %v1470_v0  ;;  %p2258_p3 = pnand %p2257_p2, %p2251_p13 }
 0x537   : > { %2162 = vmatprep.subr.msk.mxu1 %vm396_vm2, %v1485_v29 }
 0x538   : > { %2163 = vmatpush1.msk.msra.mxu1 %vm396_vm2, %v1478_v28 }
 0x539   : > { %2164 = vmatmul.mubr.msk.f32.vlgmr.msra.gmra.mxu1 %vm392_vm3, %v2161_v30 }
 0x585   : > { %v1911_v31 = vpop.permute.xlu0 %1910 }
 0x589   : > { %v1907_v32 = vpop.permute.xlu0 %1906  ;;  %v1883_v33 = vpop.permute.xlu1 %1882 }
 0x58a   : > { %v1940_v41 = vsel %vm770_vm9, %v2876_v13, %v1907_v32 }
 0x58b   : > { %v1941_v53 = vsel %vm1006_vm11, %v1940_v41, %v1911_v31 }
 0x58d   : > { %v1915_v34 = vpop.permute.xlu0 %1914  ;;  %v1879_v35 = vpop.permute.xlu1 %1878 }
 0x58e   : > { %v1942_v1 = vsel %vm1008_vm12, %v1941_v53, %v1915_v34  ;;  %v1933_v5 = vsel %vm770_vm9, %v2893_v23, %v1879_v35 }
 0x58f   : > { %v1934_v50 = vsel %vm1006_vm11, %v1933_v5, %v1883_v33 }
 0x591   : > { %v1887_v37 = vpop.permute.xlu0 %1886  ;;  %v1919_v40 = vpop.permute.xlu1 %1918 }
 0x592   : > { %v1943_v58 = vsel %vm1010_vm13, %v1942_v1, %v1919_v40  ;;  %v1935_v8 = vsel %vm1008_vm12, %v1934_v50, %v1887_v37 }
 0x595   : > { %v1891_v42 = vpop.permute.xlu0 %1890  ;;  %v1899_v52 = vpop.permute.xlu1 %1898 }
 0x596   : > { %v1936_v62 = vsel %vm1010_vm13, %v1935_v8, %v1891_v42 }
 0x599   : > { %v1927_v56 = vpop.permute.xlu0 %1926  ;;  %v1923_v51 = vpop.permute.xlu1 %1922 }
 0x59a   : > { %v1944_v59 = vsel %vm1012_vm14, %v1943_v58, %v1923_v51 }
 0x59b   : > { %v1945_v25 = vsel %vm1014_vm15, %v1944_v59, %v1927_v56 }
 0x59d   : > { %v1931_v13 = vpop.permute.xlu0 %1930  ;;  %v1895_v43 = vpop.permute.xlu1 %1894 }
 0x59e   : > { %v1946_v2 = vsel %vm1016_vm0, %v1945_v25, %v1931_v13  ;;  %v1937_v23 = vsel %vm1012_vm14, %v1936_v62, %v1895_v43 }
 0x59f   : > { %2166 = vmatprep.subr.msk.mxu0 %vm396_vm2, %v1946_v2  ;;  %v1938_v9 = vsel %vm1014_vm15, %v1937_v23, %v1899_v52 }
 0x5a1   : > { %v1903_v38 = vpop.permute.xlu1 %1902 }
 0x5a2   : > { %v1939_v54 = vsel %vm1016_vm0, %v1938_v9, %v1903_v38 }
 0x5a3   : > { %2167 = vmatpush1.msk.msra.mxu0 %vm396_vm2, %v1939_v54 }
 0x5a4   : > { %2168 = vmatmul.mubr.msk.f32.vlgmr.msra.gmra.mxu0 %vm392_vm3, %v2165_v44 }
 0x5aa   : > { %v2038_v57 = vpop.permute.xlu0 %2037 }
 0x5ab   : > { %v2045_v22 = vrot.slane %v2038_v57, %v2044_v15 }
 0x5ae   : > { %v2052_v17 = vpop.permute.xlu1 %2051 }
 0x5af   : > { %v2059_v60 = vrot.slane %v2052_v17, %v2044_v15 }
 0x5f1   : > { %v1100_v45 = vpop.f32.mrf.mxu0 }
 0x5f3   : > { %v1102_v11 = vpop.f32.mrf.mxu0 }
 0x5f4   : > { %v1107_v27 = vcombine.low %v1100_v45, %v1102_v11 }
 0x5f6   : > { %v1109_v4 = vadd.f32 %v1107_v27, %v476_v16 }
 0x5f9   : > { %v1561_v12 = vpop.f32.mrf.mxu1 }
 0x5fb   : > { %v1563_v48 = vpop.f32.mrf.mxu1 }
 0x5fc   : > { %v1568_v6 = vcombine.low %v1561_v12, %v1563_v48 }
 0x5fe   : > { %v1570_v18 = vadd.f32 %v1568_v6, %v1109_v4 }
 0x664   : > { %v2022_v10 = vpop.f32.mrf.mxu0 }
 0x666   : > { %v2024_v63 = vpop.f32.mrf.mxu0 }
 0x667   : > { %v2029_v21 = vcombine.low %v2022_v10, %v2024_v63 }
 0x669   : > { %v2031_v55 = vadd.f32 %v2029_v21, %v1570_v18 }
 0x66b   : > { %v2047_v39 = vmul.f32 %v2045_v22, %v2031_v55 }
 0x66d   : > { %v2061_v14 = vadd.f32 %v2059_v60, %v2047_v39 }
 0x66f   : > { %v2062_v19 = vsub.f32 0.0, %v2061_v14 }
 0x671   : > { %v2063_v3 = vmul.f32 1.442695, %v2062_v19 }
 0x673   : > { %2244 = vpow2.f32 %v2063_v3 }
 0x680   : > { %v2245_v24 = vpop.eup %2244 }
 0x681   : > { %v2065_v20 = vadd.f32 1.0, %v2245_v24 }
 0x683   : > { %2246 = vrcp.f32 %v2065_v20 }
 0x690   : > { %v2247_v36 = vpop.eup %2246 }
 0x691   : > { %v2068_v26 = vmul.f32 %v2247_v36, %v2061_v14 }
 0x693   : > { %2069 = vst [vmem:[%s271_s23] sm:$0xff] %v2068_v26 }
 0x694   : > { %2261 = shalt.err (!%p2258_p3)
}
 0x695   : > { %s2262_s18 = scalar_lea.hbm %s2083_s15, 128  ;;  %s2266_s21 = scalar_lea.hbm %s3054_s7, 256 }
 0x696   : > { %p2263_p4 = scmp.ne.s32.totalorder %s2083_s15, %s2262_s18  ;;  %p2267_p9 = scmp.lt.s32.totalorder %s2083_s15, %s3054_s7 }
 0x697   : > { %p2268_p10 = scmp.lt.s32.totalorder %s2266_s21, %s2262_s18 }
 0x698   : > { %p2264_p7 = pnand %p2263_p4, %p2407_p5 }
 0x699   : > { %p2269_p11 = por %p2268_p10, %p2267_p9 }
 0x69a   : > { %p2265_p8 = pneg %p2264_p7 }
 0x69c   : > { %p2270_p12 = pnand %p2269_p11, %p2265_p8 }
 0x69e   : > { %2273 = shalt.err (!%p2270_p12)
}
 0x69f   : > { %2176 = dma.vmem_to_hbm [thread:$0]  (%p2407_p5), %s2086_s9, 128, %s2083_s15, %s2071_s29  }
 0x6a0 PF: > { %p2182_p13 = scmp.ge.s32.totalorder %s2308_s27, 2  ;;  %s2097_s13 = sand.u32 1, %s2296_s24  }
 0x6a1   : > { %s2098_s14 = scalar_lea.sflag [#allocation6], %s2097_s13 }
 0x6a2   : > { %p2179_p0 = pnand %p2182_p13, %p2411_p6 }
 0x6a4   : > { %p2180_p1 = pneg %p2179_p0 }
 0x6a6   : > { %2291 = dma.done.wait (%p2180_p1), %s2098_s14, 128  }
 0x6a7   : > { %2293 = vsyncadd (%p2180_p1), %s2098_s14, 4294967168  ;;  %p17_p2 = scmp.ge.s32.totalorder %s2394_s30, 4   ;;  %s3057_s24 = smov %s2300_s25 }
 0x6a8   : > { %s3058_s25 = smov %s2304_s26  ;;  %s3059_s26 = smov %s2405_s10 }
 0x6a9   : > { %s3060_s27 = smov %s2394_s30  ;;  %19 = sbr.rel (!%p17_p2) target bundleno = 3 (0x3), region = 86 }
 0x6ae   :  { %2103 = vsyncpa [#allocation6], 1 }
 0x6af   :  { %2105 = vsyncpa [#allocation6 + $0x1], 1 }

</bundles_post_ra>
